<compile_context>
chip_gen: v5e
topology: v5e:2x2
jax: 0.10.0
libtpu: 0.0.40
codegen_flags: <defaults>
</compile_context>

<pallas_src>
import numpy as np
import jax
import jax.numpy as jnp
from jax.experimental import pallas as pl
from jax.experimental.pallas import tpu as pltpu

H = 256  # hidden width fixed by the module


def _round_up(a, m):
    return ((a + m - 1) // m) * m


def make_mdn_kernel(num_gaussians, out_w_pad):
    """Fused MDN forward for one (TILE_B, in_features) batch tile."""
    G = num_gaussians

    def mm(a, w_ref):
        # Weights are pre-cast (bf16 by default) in the wrapper; only the f32
        # activation needs a per-step cast.  MXU matmul with f32 accumulation.
        return jnp.dot(a.astype(w_ref.dtype), w_ref[...],
                       preferred_element_type=jnp.float32)

    def dense_relu(a, w_ref, b_ref):
        return jnp.maximum(mm(a, w_ref) + b_ref[...], 0.0)

    def kernel(x_ref,
               w1_ref, b1_ref,                       # fused first layer (in, 4H)
               piw2_ref, pib2_ref, muw2_ref, mub2_ref,
               lamw2_ref, lamb2_ref, uw2_ref, ub2_ref,
               piw3_ref, pib3_ref,                   # pi third hidden layer
               headw_ref, headb_ref,                 # block-diagonal fused heads
               out_ref):
        x = x_ref[...]                                             # (TB, in)

        # ---- fused first layer across the 4 branches (shared input x) ----
        h1 = jnp.maximum(mm(x, w1_ref) + b1_ref[...], 0.0)         # (TB, 4H)
        h1_pi, h1_mu = h1[:, 0 * H:1 * H], h1[:, 1 * H:2 * H]
        h1_lam, h1_u = h1[:, 2 * H:3 * H], h1[:, 3 * H:4 * H]

        # ---- second hidden layers (H -> H, full-width MXU matmuls) ----
        h2_pi  = dense_relu(h1_pi,  piw2_ref,  pib2_ref)
        h2_mu  = dense_relu(h1_mu,  muw2_ref,  mub2_ref)
        h2_lam = dense_relu(h1_lam, lamw2_ref, lamb2_ref)
        h2_u   = dense_relu(h1_u,   uw2_ref,   ub2_ref)

        # ---- pi branch has a third hidden layer ----
        h3_pi  = dense_relu(h2_pi,  piw3_ref,  pib3_ref)

        # ---- fused block-diagonal head: one K=4H matmul directly into the
        #      lane-dense packed output slab [pi | mu | lam | U | pad] ----
        cdt = headw_ref.dtype
        h_cat = jnp.concatenate(
            [h3_pi.astype(cdt), h2_mu.astype(cdt),
             h2_lam.astype(cdt), h2_u.astype(cdt)], axis=1)        # (TB, 4H)
        z = jnp.dot(h_cat, headw_ref[...],
                    preferred_element_type=jnp.float32) + headb_ref[...]

        lane = jax.lax.broadcasted_iota(jnp.int32, z.shape, 1)
        is_pi  = lane < G               # softmax lanes
        is_exp = lane >= 4 * G          # lam / U / pad lanes (mu lanes pass through)

        # softmax restricted to the pi lanes
        z_pi  = jnp.where(is_pi, z, -1e30)
        m     = jnp.max(z_pi, axis=1, keepdims=True)
        e_pi  = jnp.exp(z_pi - m)                       # masked lanes -> ~0
        denom = jnp.sum(e_pi, axis=1, keepdims=True)
        pi    = e_pi * pl.reciprocal(denom, approx=True)   # divide on idle EUP slot

        # exp for lam / U lanes.  Padded lanes (zero weight + zero bias) give
        # exp(0)=1 and padded batch rows see bias-only activations -> always
        # finite; both are sliced off in the wrapper and never consumed.
        e_all = jnp.exp(z)

        out_ref[...] = jnp.where(is_pi, pi, jnp.where(is_exp, e_all, z))

    return kernel


def mdn_forward(x, packed_params, num_gaussians, *, tile_b=256):
    """x: (B, in_features) f32 -> (pi, mu, lam, U) matching MDN.forward."""
    B, in_features = x.shape
    G = num_gaussians
    out_w = 16 * G                          # G + 3G + 3G + 9G packed along lanes
    out_w_pad = packed_params[-1].shape[1]  # already padded to a 128 multiple
    compute_dtype = packed_params[0].dtype

    # Batch tiling: big tiles amortize the per-step MXU weight pushes; for
    # small B shrink the tile so the grid keeps >= 2 steps (v7x megacore).
    if B > tile_b:
        tb = tile_b
    else:
        tb = min(tile_b, max(8, _round_up((B + 1) // 2, 8)))
    n_tiles = pl.cdiv(B, tb)
    Bp = n_tiles * tb

    xc = x.astype(compute_dtype)            # pre-cast LHS once in the wrapper
    if Bp != B:
        xc = jnp.pad(xc, ((0, Bp - B), (0, 0)))

    def resident(arr):
        # full-array block, constant block index -> DMA'd once, VMEM-resident
        return pl.BlockSpec(arr.shape, lambda b: (0, 0))

    in_specs = ([pl.BlockSpec((tb, in_features), lambda b: (b, 0))]
                + [resident(p) for p in packed_params])
    out_specs = pl.BlockSpec((tb, out_w_pad), lambda b: (b, 0))

    n_weight_bytes = int(sum(int(np.prod(p.shape)) * p.dtype.itemsize
                             for p in packed_params))
    flops = 2 * Bp * (in_features * 4 * H + 4 * H * H + H * H + 4 * H * out_w_pad)
    transcendentals = Bp * (2 * out_w_pad + 1)
    bytes_accessed = (Bp * in_features * xc.dtype.itemsize
                      + Bp * out_w_pad * 4 + n_weight_bytes)

    out = pl.pallas_call(
        make_mdn_kernel(G, out_w_pad),
        out_shape=jax.ShapeDtypeStruct((Bp, out_w_pad), jnp.float32),
        grid=(n_tiles,),
        in_specs=in_specs,
        out_specs=out_specs,
        compiler_params=pltpu.CompilerParams(
            dimension_semantics=("parallel",),          # megacore on v7x
            vmem_limit_bytes=32 * 1024 * 1024),         # plenty up to tile_b~512
        cost_estimate=pl.CostEstimate(flops=flops,
                                      transcendentals=transcendentals,
                                      bytes_accessed=bytes_accessed),
    )(xc, *packed_params)

    out = out[:B, :out_w]
    pi  = out[:, 0 * G:1 * G]
    mu  = out[:, 1 * G:4 * G].reshape(B, G, 3)
    lam = out[:, 4 * G:7 * G].reshape(B, G, 3)
    U   = out[:, 7 * G:16 * G].reshape(B, G, 3, 3)
    return pi, mu, lam, U


def init_params(key, in_features, num_gaussians):
    """nn.Linear-style U(-1/sqrt(in), 1/sqrt(in)) init, weights pre-transposed
    to (in, out), biases (out,)."""
    G = num_gaussians

    def linear(k, fan_in, fan_out):
        kw, kb = jax.random.split(k)
        bound = 1.0 / np.sqrt(fan_in)
        w = jax.random.uniform(kw, (fan_in, fan_out), jnp.float32, -bound, bound)
        b = jax.random.uniform(kb, (fan_out,), jnp.float32, -bound, bound)
        return w, b

    ks = jax.random.split(key, 13)
    return {
        "pi_1":  linear(ks[0],  in_features, H),
        "pi_2":  linear(ks[1],  H, H),
        "pi_3":  linear(ks[2],  H, H),
        "pi_4":  linear(ks[3],  H, G),
        "mu_1":  linear(ks[4],  in_features, H),
        "mu_2":  linear(ks[5],  H, H),
        "mu_3":  linear(ks[6],  H, 3 * G),
        "lam_1": linear(ks[7],  in_features, H),
        "lam_2": linear(ks[8],  H, H),
        "lam_3": linear(ks[9],  H, 3 * G),
        "U_1":   linear(ks[10], in_features, H),
        "U_2":   linear(ks[11], H, H),
        "U_3":   linear(ks[12], H, 9 * G),
    }


def pack_params(raw, num_gaussians, compute_dtype=jnp.bfloat16):
    """Pack raw per-layer params into the fused kernel layout.

    - first layer: columns concatenated [pi|mu|lam|U] -> one (in, 4H) matmul
    - heads: block-diagonal (4H, out_w_pad) weight, rows [pi3|mu2|lam2|U2],
      columns [pi(G) | mu(3G) | lam(3G) | U(9G) | zero-pad to 128 multiple]
    - matmul weights cast once to compute_dtype; biases stay f32 (added to
      the f32 accumulator).
    """
    G = num_gaussians
    out_w = 16 * G
    out_w_pad = _round_up(out_w, 128)

    def wcast(w):
        return w.astype(compute_dtype)

    def brow(b):
        return b.reshape(1, -1).astype(jnp.float32)

    w1 = jnp.concatenate([raw["pi_1"][0], raw["mu_1"][0],
                          raw["lam_1"][0], raw["U_1"][0]], axis=1)   # (in, 4H)
    b1 = jnp.concatenate([raw["pi_1"][1], raw["mu_1"][1],
                          raw["lam_1"][1], raw["U_1"][1]], axis=0).reshape(1, -1)

    head_w = jnp.zeros((4 * H, out_w_pad), jnp.float32)
    head_b = jnp.zeros((1, out_w_pad), jnp.float32)
    pw4, pb4 = raw["pi_4"]
    mw3, mb3 = raw["mu_3"]
    lw3, lb3 = raw["lam_3"]
    uw3, ub3 = raw["U_3"]
    head_w = head_w.at[0 * H:1 * H, 0:G].set(pw4)
    head_w = head_w.at[1 * H:2 * H, G:4 * G].set(mw3)
    head_w = head_w.at[2 * H:3 * H, 4 * G:7 * G].set(lw3)
    head_w = head_w.at[3 * H:4 * H, 7 * G:16 * G].set(uw3)
    head_b = head_b.at[0, 0:G].set(pb4)
    head_b = head_b.at[0, G:4 * G].set(mb3)
    head_b = head_b.at[0, 4 * G:7 * G].set(lb3)
    head_b = head_b.at[0, 7 * G:16 * G].set(ub3)

    return (wcast(w1), b1.astype(jnp.float32),
            wcast(raw["pi_2"][0]),  brow(raw["pi_2"][1]),
            wcast(raw["mu_2"][0]),  brow(raw["mu_2"][1]),
            wcast(raw["lam_2"][0]), brow(raw["lam_2"][1]),
            wcast(raw["U_2"][0]),   brow(raw["U_2"][1]),
            wcast(raw["pi_3"][0]),  brow(raw["pi_3"][1]),
            wcast(head_w), head_b)


def mdn_reference(x, raw, num_gaussians, compute_dtype=jnp.bfloat16):
    """Pure-JAX reference with identical forward semantics and the same
    bf16-input / f32-accumulate matmul precision as the kernel."""
    G = num_gaussians
    B = x.shape[0]

    def dense(a, wb):
        w, b = wb
        return jnp.dot(a.astype(compute_dtype), w.astype(compute_dtype),
                       preferred_element_type=jnp.float32) + b

    relu = jax.nn.relu
    h_pi = relu(dense(x, raw["pi_1"]))
    h_pi = relu(dense(h_pi, raw["pi_2"]))
    h_pi = relu(dense(h_pi, raw["pi_3"]))
    pi = jax.nn.softmax(dense(h_pi, raw["pi_4"]), axis=1)

    h_mu = relu(dense(x, raw["mu_1"]))
    h_mu = relu(dense(h_mu, raw["mu_2"]))
    mu = dense(h_mu, raw["mu_3"]).reshape(B, G, 3)

    h_l = relu(dense(x, raw["lam_1"]))
    h_l = relu(dense(h_l, raw["lam_2"]))
    lam = jnp.exp(dense(h_l, raw["lam_3"])).reshape(B, G, 3)

    h_u = relu(dense(x, raw["U_1"]))
    h_u = relu(dense(h_u, raw["U_2"]))
    U = jnp.exp(dense(h_u, raw["U_3"])).reshape(B, G, 3, 3)
    return pi, mu, lam, U


# TODO(synk): gaussian_probability / gaussian_probability2 / mdn_loss1 /
# gramschmidt (torch.qr, torch.inverse on 3x3 matrices) are training/eval
# helpers outside forward() and are not implemented as Pallas kernels.

if __name__ == "__main__":
    # small shapes; out_features=3 is stored by the module but unused in forward
    B, in_features, out_features, num_gaussians = 50, 16, 3, 5

    key = jax.random.PRNGKey(0)
    kx, kp = jax.random.split(key)
    x = jax.random.normal(kx, (B, in_features), dtype=jnp.float32)

    raw = init_params(kp, in_features, num_gaussians)
    params = pack_params(raw, num_gaussians, compute_dtype=jnp.bfloat16)

    pi, mu, lam, U = jax.block_until_ready(
        mdn_forward(x, params, num_gaussians, tile_b=256))

    assert pi.shape == (B, num_gaussians)
    assert mu.shape == (B, num_gaussians, 3)
    assert lam.shape == (B, num_gaussians, 3)
    assert U.shape == (B, num_gaussians, 3, 3)

    rpi, rmu, rlam, rU = jax.block_until_ready(
        mdn_reference(x, raw, num_gaussians, compute_dtype=jnp.bfloat16))

    # kernel and reference share identical bf16 matmul inputs / f32 accumulate,
    # so the only deltas are accumulation order + approx reciprocal
    np.testing.assert_allclose(np.asarray(pi),  np.asarray(rpi),  rtol=1e-2, atol=1e-2)
    np.testing.assert_allclose(np.asarray(mu),  np.asarray(rmu),  rtol=1e-2, atol=1e-2)
    np.testing.assert_allclose(np.asarray(lam), np.asarray(rlam), rtol=1e-2, atol=1e-2)
    np.testing.assert_allclose(np.asarray(U),   np.asarray(rU),   rtol=1e-2, atol=1e-2)

    print("KERNEL_OK")
</pallas_src>

<mosaic_0001>
module attributes {stable_mosaic.version = 11 : i64} {
  func.func @kernel(%arg0: i32, %arg1: memref<32x16xbf16, #tpu.memory_space<vmem>>, %arg2: memref<16x1024xbf16, #tpu.memory_space<vmem>>, %arg3: memref<1x1024xf32, #tpu.memory_space<vmem>>, %arg4: memref<256x256xbf16, #tpu.memory_space<vmem>>, %arg5: memref<1x256xf32, #tpu.memory_space<vmem>>, %arg6: memref<256x256xbf16, #tpu.memory_space<vmem>>, %arg7: memref<1x256xf32, #tpu.memory_space<vmem>>, %arg8: memref<256x256xbf16, #tpu.memory_space<vmem>>, %arg9: memref<1x256xf32, #tpu.memory_space<vmem>>, %arg10: memref<256x256xbf16, #tpu.memory_space<vmem>>, %arg11: memref<1x256xf32, #tpu.memory_space<vmem>>, %arg12: memref<256x256xbf16, #tpu.memory_space<vmem>>, %arg13: memref<1x256xf32, #tpu.memory_space<vmem>>, %arg14: memref<1024x128xbf16, #tpu.memory_space<vmem>>, %arg15: memref<1x128xf32, #tpu.memory_space<vmem>>, %arg16: memref<32x128xf32, #tpu.memory_space<vmem>>) attributes {dimension_semantics = [#tpu.dimension_semantics<parallel>], iteration_bounds = array<i64: 2>, scalar_prefetch = 0 : i64, scratch_operands = 0 : i64, tpu.core_type = #tpu.core_type<tc>, window_params = [{transform_indices = @transform_0, window_bounds = array<i64: 32, 16>}, {pipeline_mode = #tpu.pipeline_mode<synchronous>, transform_indices = @transform_1, window_bounds = array<i64: 16, 1024>}, {pipeline_mode = #tpu.pipeline_mode<synchronous>, transform_indices = @transform_2, window_bounds = array<i64: 1, 1024>}, {pipeline_mode = #tpu.pipeline_mode<synchronous>, transform_indices = @transform_3, window_bounds = array<i64: 256, 256>}, {pipeline_mode = #tpu.pipeline_mode<synchronous>, transform_indices = @transform_4, window_bounds = array<i64: 1, 256>}, {pipeline_mode = #tpu.pipeline_mode<synchronous>, transform_indices = @transform_5, window_bounds = array<i64: 256, 256>}, {pipeline_mode = #tpu.pipeline_mode<synchronous>, transform_indices = @transform_6, window_bounds = array<i64: 1, 256>}, {pipeline_mode = #tpu.pipeline_mode<synchronous>, transform_indices = @transform_7, window_bounds = array<i64: 256, 256>}, {pipeline_mode = #tpu.pipeline_mode<synchronous>, transform_indices = @transform_8, window_bounds = array<i64: 1, 256>}, {pipeline_mode = #tpu.pipeline_mode<synchronous>, transform_indices = @transform_9, window_bounds = array<i64: 256, 256>}, {pipeline_mode = #tpu.pipeline_mode<synchronous>, transform_indices = @transform_10, window_bounds = array<i64: 1, 256>}, {pipeline_mode = #tpu.pipeline_mode<synchronous>, transform_indices = @transform_11, window_bounds = array<i64: 256, 256>}, {pipeline_mode = #tpu.pipeline_mode<synchronous>, transform_indices = @transform_12, window_bounds = array<i64: 1, 256>}, {pipeline_mode = #tpu.pipeline_mode<synchronous>, transform_indices = @transform_13, window_bounds = array<i64: 1024, 128>}, {pipeline_mode = #tpu.pipeline_mode<synchronous>, transform_indices = @transform_14, window_bounds = array<i64: 1, 128>}, {transform_indices = @transform_15, window_bounds = array<i64: 32, 128>}]} {
    %c0 = arith.constant 0 : index
    %c0_0 = arith.constant 0 : index
    %0 = vector.load %arg1[%c0, %c0_0] : memref<32x16xbf16, #tpu.memory_space<vmem>>, vector<32x16xbf16>
    %c0_1 = arith.constant 0 : index
    %c0_2 = arith.constant 0 : index
    %1 = vector.load %arg2[%c0_1, %c0_2] : memref<16x1024xbf16, #tpu.memory_space<vmem>>, vector<16x1024xbf16>
    %cst = arith.constant dense<0.000000e+00> : vector<32x1024xf32>
    %2 = tpu.matmul %0, %1, %cst {dimension_numbers = #tpu.dot_dimension_numbers<[1], [0], [0], [1], [0, 0, 1, 1], [], []>} : vector<32x16xbf16>, vector<16x1024xbf16>, vector<32x1024xf32> -> vector<32x1024xf32>
    %c0_3 = arith.constant 0 : index
    %c0_4 = arith.constant 0 : index
    %3 = vector.load %arg3[%c0_3, %c0_4] : memref<1x1024xf32, #tpu.memory_space<vmem>>, vector<1x1024xf32>
    %4 = vector.broadcast %3 : vector<1x1024xf32> to vector<32x1024xf32>
    %5 = arith.addf %2, %4 : vector<32x1024xf32>
    %cst_5 = arith.constant 0.000000e+00 : f32
    %6 = vector.broadcast %cst_5 : f32 to vector<32x1024xf32>
    %7 = arith.maximumf %5, %6 : vector<32x1024xf32>
    %8 = vector.extract_strided_slice %7 {offsets = [0, 0], sizes = [32, 256], strides = [1, 1]} : vector<32x1024xf32> to vector<32x256xf32>
    %9 = vector.extract_strided_slice %7 {offsets = [0, 256], sizes = [32, 256], strides = [1, 1]} : vector<32x1024xf32> to vector<32x256xf32>
    %10 = vector.extract_strided_slice %7 {offsets = [0, 512], sizes = [32, 256], strides = [1, 1]} : vector<32x1024xf32> to vector<32x256xf32>
    %11 = vector.extract_strided_slice %7 {offsets = [0, 768], sizes = [32, 256], strides = [1, 1]} : vector<32x1024xf32> to vector<32x256xf32>
    %12 = arith.truncf %8 : vector<32x256xf32> to vector<32x256xbf16>
    %c0_6 = arith.constant 0 : index
    %c0_7 = arith.constant 0 : index
    %13 = vector.load %arg4[%c0_6, %c0_7] : memref<256x256xbf16, #tpu.memory_space<vmem>>, vector<256x256xbf16>
    %cst_8 = arith.constant dense<0.000000e+00> : vector<32x256xf32>
    %14 = tpu.matmul %12, %13, %cst_8 {dimension_numbers = #tpu.dot_dimension_numbers<[1], [0], [0], [1], [0, 0, 1, 1], [], []>} : vector<32x256xbf16>, vector<256x256xbf16>, vector<32x256xf32> -> vector<32x256xf32>
    %c0_9 = arith.constant 0 : index
    %c0_10 = arith.constant 0 : index
    %15 = vector.load %arg5[%c0_9, %c0_10] : memref<1x256xf32, #tpu.memory_space<vmem>>, vector<1x256xf32>
    %16 = vector.broadcast %15 : vector<1x256xf32> to vector<32x256xf32>
    %17 = arith.addf %14, %16 : vector<32x256xf32>
    %cst_11 = arith.constant 0.000000e+00 : f32
    %18 = vector.broadcast %cst_11 : f32 to vector<32x256xf32>
    %19 = arith.maximumf %17, %18 : vector<32x256xf32>
    %20 = arith.truncf %9 : vector<32x256xf32> to vector<32x256xbf16>
    %c0_12 = arith.constant 0 : index
    %c0_13 = arith.constant 0 : index
    %21 = vector.load %arg6[%c0_12, %c0_13] : memref<256x256xbf16, #tpu.memory_space<vmem>>, vector<256x256xbf16>
    %cst_14 = arith.constant dense<0.000000e+00> : vector<32x256xf32>
    %22 = tpu.matmul %20, %21, %cst_14 {dimension_numbers = #tpu.dot_dimension_numbers<[1], [0], [0], [1], [0, 0, 1, 1], [], []>} : vector<32x256xbf16>, vector<256x256xbf16>, vector<32x256xf32> -> vector<32x256xf32>
    %c0_15 = arith.constant 0 : index
    %c0_16 = arith.constant 0 : index
    %23 = vector.load %arg7[%c0_15, %c0_16] : memref<1x256xf32, #tpu.memory_space<vmem>>, vector<1x256xf32>
    %24 = vector.broadcast %23 : vector<1x256xf32> to vector<32x256xf32>
    %25 = arith.addf %22, %24 : vector<32x256xf32>
    %cst_17 = arith.constant 0.000000e+00 : f32
    %26 = vector.broadcast %cst_17 : f32 to vector<32x256xf32>
    %27 = arith.maximumf %25, %26 : vector<32x256xf32>
    %28 = arith.truncf %10 : vector<32x256xf32> to vector<32x256xbf16>
    %c0_18 = arith.constant 0 : index
    %c0_19 = arith.constant 0 : index
    %29 = vector.load %arg8[%c0_18, %c0_19] : memref<256x256xbf16, #tpu.memory_space<vmem>>, vector<256x256xbf16>
    %cst_20 = arith.constant dense<0.000000e+00> : vector<32x256xf32>
    %30 = tpu.matmul %28, %29, %cst_20 {dimension_numbers = #tpu.dot_dimension_numbers<[1], [0], [0], [1], [0, 0, 1, 1], [], []>} : vector<32x256xbf16>, vector<256x256xbf16>, vector<32x256xf32> -> vector<32x256xf32>
    %c0_21 = arith.constant 0 : index
    %c0_22 = arith.constant 0 : index
    %31 = vector.load %arg9[%c0_21, %c0_22] : memref<1x256xf32, #tpu.memory_space<vmem>>, vector<1x256xf32>
    %32 = vector.broadcast %31 : vector<1x256xf32> to vector<32x256xf32>
    %33 = arith.addf %30, %32 : vector<32x256xf32>
    %cst_23 = arith.constant 0.000000e+00 : f32
    %34 = vector.broadcast %cst_23 : f32 to vector<32x256xf32>
    %35 = arith.maximumf %33, %34 : vector<32x256xf32>
    %36 = arith.truncf %11 : vector<32x256xf32> to vector<32x256xbf16>
    %c0_24 = arith.constant 0 : index
    %c0_25 = arith.constant 0 : index
    %37 = vector.load %arg10[%c0_24, %c0_25] : memref<256x256xbf16, #tpu.memory_space<vmem>>, vector<256x256xbf16>
    %cst_26 = arith.constant dense<0.000000e+00> : vector<32x256xf32>
    %38 = tpu.matmul %36, %37, %cst_26 {dimension_numbers = #tpu.dot_dimension_numbers<[1], [0], [0], [1], [0, 0, 1, 1], [], []>} : vector<32x256xbf16>, vector<256x256xbf16>, vector<32x256xf32> -> vector<32x256xf32>
    %c0_27 = arith.constant 0 : index
    %c0_28 = arith.constant 0 : index
    %39 = vector.load %arg11[%c0_27, %c0_28] : memref<1x256xf32, #tpu.memory_space<vmem>>, vector<1x256xf32>
    %40 = vector.broadcast %39 : vector<1x256xf32> to vector<32x256xf32>
    %41 = arith.addf %38, %40 : vector<32x256xf32>
    %cst_29 = arith.constant 0.000000e+00 : f32
    %42 = vector.broadcast %cst_29 : f32 to vector<32x256xf32>
    %43 = arith.maximumf %41, %42 : vector<32x256xf32>
    %44 = arith.truncf %19 : vector<32x256xf32> to vector<32x256xbf16>
    %c0_30 = arith.constant 0 : index
    %c0_31 = arith.constant 0 : index
    %45 = vector.load %arg12[%c0_30, %c0_31] : memref<256x256xbf16, #tpu.memory_space<vmem>>, vector<256x256xbf16>
    %cst_32 = arith.constant dense<0.000000e+00> : vector<32x256xf32>
    %46 = tpu.matmul %44, %45, %cst_32 {dimension_numbers = #tpu.dot_dimension_numbers<[1], [0], [0], [1], [0, 0, 1, 1], [], []>} : vector<32x256xbf16>, vector<256x256xbf16>, vector<32x256xf32> -> vector<32x256xf32>
    %c0_33 = arith.constant 0 : index
    %c0_34 = arith.constant 0 : index
    %47 = vector.load %arg13[%c0_33, %c0_34] : memref<1x256xf32, #tpu.memory_space<vmem>>, vector<1x256xf32>
    %48 = vector.broadcast %47 : vector<1x256xf32> to vector<32x256xf32>
    %49 = arith.addf %46, %48 : vector<32x256xf32>
    %cst_35 = arith.constant 0.000000e+00 : f32
    %50 = vector.broadcast %cst_35 : f32 to vector<32x256xf32>
    %51 = arith.maximumf %49, %50 : vector<32x256xf32>
    %52 = arith.truncf %51 : vector<32x256xf32> to vector<32x256xbf16>
    %53 = arith.truncf %27 : vector<32x256xf32> to vector<32x256xbf16>
    %54 = arith.truncf %35 : vector<32x256xf32> to vector<32x256xbf16>
    %55 = arith.truncf %43 : vector<32x256xf32> to vector<32x256xbf16>
    %56 = tpu.concatenate %52, %53, %54, %55 in 1 : vector<32x256xbf16>, vector<32x256xbf16>, vector<32x256xbf16>, vector<32x256xbf16> -> vector<32x1024xbf16>
    %c0_36 = arith.constant 0 : index
    %c0_37 = arith.constant 0 : index
    %57 = vector.load %arg14[%c0_36, %c0_37] : memref<1024x128xbf16, #tpu.memory_space<vmem>>, vector<1024x128xbf16>
    %cst_38 = arith.constant dense<0.000000e+00> : vector<32x128xf32>
    %58 = tpu.matmul %56, %57, %cst_38 {dimension_numbers = #tpu.dot_dimension_numbers<[1], [0], [0], [1], [0, 0, 1, 1], [], []>} : vector<32x1024xbf16>, vector<1024x128xbf16>, vector<32x128xf32> -> vector<32x128xf32>
    %c0_39 = arith.constant 0 : index
    %c0_40 = arith.constant 0 : index
    %59 = vector.load %arg15[%c0_39, %c0_40] : memref<1x128xf32, #tpu.memory_space<vmem>>, vector<1x128xf32>
    %60 = vector.broadcast %59 : vector<1x128xf32> to vector<32x128xf32>
    %61 = arith.addf %58, %60 : vector<32x128xf32>
    %62 = tpu.iota {dimensions = array<i32: 1>} : vector<32x128xi32>
    %c5_i32 = arith.constant 5 : i32
    %63 = vector.broadcast %c5_i32 : i32 to vector<32x128xi32>
    %64 = arith.cmpi slt, %62, %63 : vector<32x128xi32>
    %c20_i32 = arith.constant 20 : i32
    %65 = vector.broadcast %c20_i32 : i32 to vector<32x128xi32>
    %66 = arith.cmpi sge, %62, %65 : vector<32x128xi32>
    %cst_41 = arith.constant -1.000000e+30 : f32
    %67 = vector.broadcast %cst_41 : f32 to vector<32x128xf32>
    %68 = arith.select %64, %61, %67 : vector<32x128xi1>, vector<32x128xf32>
    %cst_42 = arith.constant dense<0xFF800000> : vector<32xf32>
    %69 = vector.multi_reduction <maximumf>, %68, %cst_42 [1] : vector<32x128xf32> to vector<32xf32>
    %70 = vector.shape_cast %69 : vector<32xf32> to vector<32x1xf32>
    %71 = vector.broadcast %70 : vector<32x1xf32> to vector<32x128xf32>
    %72 = arith.subf %68, %71 : vector<32x128xf32>
    %73 = math.exp %72 : vector<32x128xf32>
    %cst_43 = arith.constant dense<0.000000e+00> : vector<32xf32>
    %74 = vector.multi_reduction <add>, %73, %cst_43 [1] : vector<32x128xf32> to vector<32xf32>
    %75 = vector.shape_cast %74 : vector<32xf32> to vector<32x1xf32>
    %76 = tpu.reciprocal %75 {approx = true} : vector<32x1xf32> -> vector<32x1xf32>
    %77 = vector.broadcast %76 : vector<32x1xf32> to vector<32x128xf32>
    %78 = arith.mulf %73, %77 : vector<32x128xf32>
    %79 = math.exp %61 : vector<32x128xf32>
    %80 = arith.select %66, %79, %61 : vector<32x128xi1>, vector<32x128xf32>
    %81 = arith.select %64, %78, %80 : vector<32x128xi1>, vector<32x128xf32>
    %c0_44 = arith.constant 0 : index
    %c0_45 = arith.constant 0 : index
    %82 = vector.load %arg16[%c0_44, %c0_45] : memref<32x128xf32, #tpu.memory_space<vmem>>, vector<32x128xf32>
    tpu.vector_store %arg16[%c0_44, %c0_45], %81 {strides = array<i32>} : memref<32x128xf32, #tpu.memory_space<vmem>>, vector<32x128xf32>,
    return
  }
  func.func @transform_0(%arg0: i32) -> (i32, i32) {
    %c0_i32 = arith.constant 0 : i32
    %c0_i32_0 = arith.constant 0 : i32
    return %arg0, %c0_i32 : i32, i32
  }
  func.func @transform_1(%arg0: i32) -> (i32, i32) {
    %c0_i32 = arith.constant 0 : i32
    %c0_i32_0 = arith.constant 0 : i32
    %c0_i32_1 = arith.constant 0 : i32
    return %c0_i32, %c0_i32_0 : i32, i32
  }
  func.func @transform_2(%arg0: i32) -> (i32, i32) {
    %c0_i32 = arith.constant 0 : i32
    %c0_i32_0 = arith.constant 0 : i32
    %c0_i32_1 = arith.constant 0 : i32
    return %c0_i32, %c0_i32_0 : i32, i32
  }
  func.func @transform_3(%arg0: i32) -> (i32, i32) {
    %c0_i32 = arith.constant 0 : i32
    %c0_i32_0 = arith.constant 0 : i32
    %c0_i32_1 = arith.constant 0 : i32
    return %c0_i32, %c0_i32_0 : i32, i32
  }
  func.func @transform_4(%arg0: i32) -> (i32, i32) {
    %c0_i32 = arith.constant 0 : i32
    %c0_i32_0 = arith.constant 0 : i32
    %c0_i32_1 = arith.constant 0 : i32
    return %c0_i32, %c0_i32_0 : i32, i32
  }
  func.func @transform_5(%arg0: i32) -> (i32, i32) {
    %c0_i32 = arith.constant 0 : i32
    %c0_i32_0 = arith.constant 0 : i32
    %c0_i32_1 = arith.constant 0 : i32
    return %c0_i32, %c0_i32_0 : i32, i32
  }
  func.func @transform_6(%arg0: i32) -> (i32, i32) {
    %c0_i32 = arith.constant 0 : i32
    %c0_i32_0 = arith.constant 0 : i32
    %c0_i32_1 = arith.constant 0 : i32
    return %c0_i32, %c0_i32_0 : i32, i32
  }
  func.func @transform_7(%arg0: i32) -> (i32, i32) {
    %c0_i32 = arith.constant 0 : i32
    %c0_i32_0 = arith.constant 0 : i32
    %c0_i32_1 = arith.constant 0 : i32
    return %c0_i32, %c0_i32_0 : i32, i32
  }
  func.func @transform_8(%arg0: i32) -> (i32, i32) {
    %c0_i32 = arith.constant 0 : i32
    %c0_i32_0 = arith.constant 0 : i32
    %c0_i32_1 = arith.constant 0 : i32
    return %c0_i32, %c0_i32_0 : i32, i32
  }
  func.func @transform_9(%arg0: i32) -> (i32, i32) {
    %c0_i32 = arith.constant 0 : i32
    %c0_i32_0 = arith.constant 0 : i32
    %c0_i32_1 = arith.constant 0 : i32
    return %c0_i32, %c0_i32_0 : i32, i32
  }
  func.func @transform_10(%arg0: i32) -> (i32, i32) {
    %c0_i32 = arith.constant 0 : i32
    %c0_i32_0 = arith.constant 0 : i32
    %c0_i32_1 = arith.constant 0 : i32
    return %c0_i32, %c0_i32_0 : i32, i32
  }
  func.func @transform_11(%arg0: i32) -> (i32, i32) {
    %c0_i32 = arith.constant 0 : i32
    %c0_i32_0 = arith.constant 0 : i32
    %c0_i32_1 = arith.constant 0 : i32
    return %c0_i32, %c0_i32_0 : i32, i32
  }
  func.func @transform_12(%arg0: i32) -> (i32, i32) {
    %c0_i32 = arith.constant 0 : i32
    %c0_i32_0 = arith.constant 0 : i32
    %c0_i32_1 = arith.constant 0 : i32
    return %c0_i32, %c0_i32_0 : i32, i32
  }
  func.func @transform_13(%arg0: i32) -> (i32, i32) {
    %c0_i32 = arith.constant 0 : i32
    %c0_i32_0 = arith.constant 0 : i32
    %c0_i32_1 = arith.constant 0 : i32
    return %c0_i32, %c0_i32_0 : i32, i32
  }
  func.func @transform_14(%arg0: i32) -> (i32, i32) {
    %c0_i32 = arith.constant 0 : i32
    %c0_i32_0 = arith.constant 0 : i32
    %c0_i32_1 = arith.constant 0 : i32
    return %c0_i32, %c0_i32_0 : i32, i32
  }
  func.func @transform_15(%arg0: i32) -> (i32, i32) {
    %c0_i32 = arith.constant 0 : i32
    %c0_i32_0 = arith.constant 0 : i32
    return %arg0, %c0_i32 : i32, i32
  }
}

</mosaic_0001>

<bundles_post_ra>
// kernel: tpu_custom_call.1
= control target key start
LH: loop header
LB: loop body
LE: loop exit
PB: predicated region body
PF: predicated region fallthrough
CT: control target
= control target key end

     0   :  { %s5412_s0 = inlined_call_operand.vmem [shape: bf16[64,16], index: 0, kind: input, shape index: {}]   ;;  %s5413_s1 = inlined_call_operand.hbm [shape: bf16[16,1024], index: 1, kind: input, shape index: {}]   ;;  %s5414_s2 = inlined_call_operand.vmem [shape: f32[1,1024], index: 2, kind: input, shape index: {}]   ;;  %s5415_s3 = inlined_call_operand.hbm [shape: bf16[256,256], index: 3, kind: input, shape index: {}]   ;;  %s5416_s4 = inlined_call_operand.vmem [shape: f32[1,256], index: 4, kind: input, shape index: {}]   ;;  %s5417_s5 = inlined_call_operand.hbm [shape: bf16[256,256], index: 5, kind: input, shape index: {}]   ;;  %s5418_s6 = inlined_call_operand.vmem [shape: f32[1,256], index: 6, kind: input, shape index: {}]   ;;  %s5419_s7 = inlined_call_operand.hbm [shape: bf16[256,256], index: 7, kind: input, shape index: {}]   ;;  %s5420_s8 = inlined_call_operand.vmem [shape: f32[1,256], index: 8, kind: input, shape index: {}]   ;;  %s5421_s9 = inlined_call_operand.hbm [shape: bf16[256,256], index: 9, kind: input, shape index: {}]   ;;  %s5422_s10 = inlined_call_operand.vmem [shape: f32[1,256], index: 10, kind: input, shape index: {}]   ;;  %s5423_s11 = inlined_call_operand.hbm [shape: bf16[256,256], index: 11, kind: input, shape index: {}]   ;;  %s5424_s12 = inlined_call_operand.vmem [shape: f32[1,256], index: 12, kind: input, shape index: {}]   ;;  %s5425_s13 = inlined_call_operand.hbm [shape: bf16[1024,128], index: 13, kind: input, shape index: {}]   ;;  %s5426_s14 = inlined_call_operand.vmem [shape: f32[1,128], index: 14, kind: input, shape index: {}]   ;;  %s5427_s15 = inlined_call_operand.hbm [shape: f32[64,128], index: 15, kind: output, shape index: {}]  }
   0x1   :  { %5437 = sst [smem:[#allocation27_spill]] %s5413_s1 }
   0x2   :  { %5438 = sst [smem:[#allocation28_spill]] %s5415_s3 }
   0x3   :  { %5439 = sst [smem:[#allocation29_spill]] %s5419_s7 }
   0x4   :  { %5440 = sst [smem:[#allocation30_spill]] %s5423_s11 }
   0x5   :  { %5441 = sst [smem:[#allocation31_spill]] %s5427_s15 }
   0x6   :  { %20 = vsyncpa [#allocation3], 0 }
   0x7   :  { %21 = vsyncpa [#allocation6], 0 }
   0x8   :  { %22 = vsyncpa [#allocation9], 0 }
   0x9   :  { %23 = vsyncpa [#allocation12], 0 }
   0xa   :  { %24 = vsyncpa [#allocation4], 0 }
   0xb   :  { %26 = vsyncpa [#allocation4 + $0x1], 0  ;;  %s5030_s18 = smov 0   ;;  %s5032_s19 = smov 0  }
   0xc   :  { %s5034_s20 = smov 0   ;;  %s5036_s21 = smov 0  }
   0xd LB: > { %5442 = sst [smem:[#allocation20_spill]] %s4921_s18  ;;  %s5051_s22 = sadd.s32 4294967295, %s4933_s21   ;;  %s4933_s21 = sphi %s5036_s21, %s5462_s21   ;;  %s4929_s20 = sphi %s5034_s20, %s5464_s20   ;;  %s4925_s19 = sphi %s5032_s19, %s5466_s19   ;;  %s4921_s18 = sphi %s5030_s18, %s5465_s18  }
   0xe   : > { %5443 = sst [smem:[#allocation21_spill]] %s4929_s20  ;;  %s3289_s23 = sadd.s32 4294967294, %s4933_s21  }
   0xf   : > { %5444 = sst [smem:[#allocation22_spill]] %s4933_s21  ;;  %s5055_s24 = sadd.s32 1, %s4933_s21  }
  0x10   : > { %5445 = sst [smem:[#allocation23_spill]] %s5055_s24  ;;  %s359_s25 = sadd.s32 1, %s4929_s20 }
  0x11   : > { %s356_s26 = ssub.s32 %s4933_s21, %s5055_s24  ;;  %p369_p0 = scmp.ne.s32.totalorder %s4929_s20, %s4925_s19 }
  0x12   : > { %p357_p1 = scmp.eq.s32.totalorder %s356_s26, 0  ;;  %p370_p2 = scmp.eq.s32.totalorder %s5051_s22, 1 }
  0x13   : > { %p375_p3 = scmp.ne.s32.totalorder %s4925_s19, %s4921_s18  ;;  %p376_p4 = scmp.eq.s32.totalorder %s3289_s23, 1 }
  0x14   : > { %s5066_s27 = scalar_select %p357_p1, %s4929_s20, %s359_s25  }
  0x15   : > { %p5068_p5 = por %p370_p2, %p369_p0  ;;  %p5072_p6 = por %p376_p4, %p375_p3 }
  0x16   : > { %5446 = sst [smem:[#allocation24_spill]] %s5066_s27  ;;  %p3290_p7 = scmp.ge.s32.totalorder %s4933_s21, 1 }
  0x17   : > { %s5447_s28 = scalar_select %p5068_p5, 1, 0 }
  0x18   : > { %s5449_s29 = scalar_select %p5072_p6, 1, 0 }
  0x19   : > { %5448 = sst [smem:[#allocation25_spill]] %s5447_s28  ;;  %p383_p8 = scmp.lt.s32.totalorder %s4933_s21, 3 }
  0x1a   : > { %5450 = sst [smem:[#allocation26_spill]] %s5449_s29  ;;  %p4558_p9 = scmp.eq.s32.totalorder %s5051_s22, 0 }
  0x1b   : > { %p5079_p10 = pnand %p3290_p7, %p383_p8  ;;  %s5452_s3 = sld [smem:[#allocation28_spill]] }
  0x1c   : > { %s4935_s25 = smov [#allocation5]   ;;  %s5454_s7 = sld [smem:[#allocation29_spill]] }
  0x1d   : > { %p4532_p11 = pneg %p5079_p10  ;;  %s413_s26 = sshll.u32 %s4935_s25, 4  ;;  %s414_s26 = int_to_ptr.vmem [resolvable:$true] %s413_s26 }
  0x1e   : > { %s4936_s16 = smov 128   ;;  %s4937_s17 = smov 8  }
  0x1f   : > { %p5090_p12 = pnand %p4558_p9, %p4532_p11  ;;  %s4938_s25 = smov [#allocation8]  }
  0x20   : > { %s5455_s11 = sld [smem:[#allocation30_spill]]  ;;  %s4939_s15 = smov [#allocation11]  }
  0x21   : > { %s411_s23 = sshll.u32 %s5452_s3, 4  ;;  %s447_s3 = sshll.u32 %s4938_s25, 4  ;;  %s412_s23 = int_to_ptr.hbm [resolvable:$true] %s411_s23  ;;  %s448_s3 = int_to_ptr.vmem [resolvable:$true] %s447_s3 }
  0x22   : > { %s445_s29 = sshll.u32 %s5454_s7, 4  ;;  %s5456_s1 = sld [smem:[#allocation27_spill]]  ;;  %s446_s29 = int_to_ptr.hbm [resolvable:$true] %s445_s29 }
  0x23   : > { %4538 = dma.hbm_to_vmem [thread:$0]  (!%p5090_p12), %s412_s23, 4096, %s414_s26, [#allocation6], %s4936_s16, %s4936_s16, %s4937_s17  }
  0x24   : > { %4544 = dma.hbm_to_vmem [thread:$0]  (!%p5090_p12), %s446_s29, 4096, %s448_s3, [#allocation9], %s4936_s16, %s4936_s16, %s4937_s17  }
  0x25   : > { %s481_s23 = sshll.u32 %s4939_s15, 4  ;;  %s4940_s18 = smov [#allocation2]   ;;  %s482_s23 = int_to_ptr.vmem [resolvable:$true] %s481_s23 }
  0x26   : > { %s479_s28 = sshll.u32 %s5455_s11, 4  ;;  %s396_s21 = sshll.u32 %s4940_s18, 4  ;;  %s480_s28 = int_to_ptr.hbm [resolvable:$true] %s479_s28  ;;  %s397_s21 = int_to_ptr.vmem [resolvable:$true] %s396_s21 }
  0x27   : > { %4550 = dma.hbm_to_vmem [thread:$0]  (!%p5090_p12), %s480_s28, 4096, %s482_s23, [#allocation12], %s4936_s16, %s4936_s16, %s4937_s17  }
  0x28   : > { %s394_s7 = sshll.u32 %s5456_s1, 4  ;;  %s4941_s26 = smov 512   ;;  %s395_s7 = int_to_ptr.hbm [resolvable:$true] %s394_s7 }
  0x29   : > { %s4942_s3 = smov 32   ;;  %s428_s15 = sshll.u32 %s5417_s5, 4  ;;  %s429_s15 = int_to_ptr.hbm [resolvable:$true] %s428_s15 }
  0x2a   : > { %4535 = dma.hbm_to_vmem [thread:$0]  (!%p5090_p12), %s395_s7, 1024, %s397_s21, [#allocation3], %s4941_s26, %s4941_s26, %s4942_s3  }
  0x2b   : > { %s4943_s20 = smov [#allocation7]   ;;  %s462_s28 = sshll.u32 %s5421_s9, 4  ;;  %s463_s28 = int_to_ptr.hbm [resolvable:$true] %s462_s28 }
  0x2c   : > { %s430_s24 = sshll.u32 %s4943_s20, 4  ;;  %s4944_s7 = smov [#allocation10]   ;;  %s431_s24 = int_to_ptr.vmem [resolvable:$true] %s430_s24 }
  0x2d   : > { %4541 = dma.hbm_to_vmem [thread:$0]  (!%p5090_p12), %s429_s15, 4096, %s431_s24, [#allocation6], %s4936_s16, %s4936_s16, %s4937_s17  }
  0x2e   : > { %s464_s23 = sshll.u32 %s4944_s7, 4  ;;  %s496_s26 = sshll.u32 %s5425_s13, 4  ;;  %s465_s23 = int_to_ptr.vmem [resolvable:$true] %s464_s23  ;;  %s497_s26 = int_to_ptr.hbm [resolvable:$true] %s496_s26 }
  0x2f   : > { %4547 = dma.hbm_to_vmem [thread:$0]  (!%p5090_p12), %s463_s28, 4096, %s465_s23, [#allocation9], %s4936_s16, %s4936_s16, %s4937_s17  }
  0x30   : > { %s4945_s1 = smov [#allocation13]   ;;  %s4946_s3 = smov 64  }
  0x31   : > { %s498_s11 = sshll.u32 %s4945_s1, 4  ;;  %s4947_s29 = smov 4   ;;  %s499_s11 = int_to_ptr.vmem [resolvable:$true] %s498_s11 }
  0x32   : > { %4553 = dma.hbm_to_vmem [thread:$0]  (!%p5090_p12), %s497_s26, 8192, %s499_s11, [#allocation12], %s4946_s3, %s4946_s3, %s4947_s29  }
  0x33   : > { %526 = sbr.rel (%p5079_p10) target bundleno = 956 (0x3bc), region = 80 }
  0x38   : > { %4900 = dma.done.wait (%p4558_p9), [#allocation3], 1024  }
  0x39   : > { %4902 = vsyncadd (%p4558_p9), [#allocation3], 4294966272 }
  0x3a   : > { %4904 = dma.done.wait (%p4558_p9), [#allocation6], 8192  }
  0x3b   : > { %4906 = vsyncadd (%p4558_p9), [#allocation6], 4294959104 }
  0x3c   : > { %4908 = dma.done.wait (%p4558_p9), [#allocation9], 8192  }
  0x3d   : > { %4910 = vsyncadd (%p4558_p9), [#allocation9], 4294959104 }
  0x3e   : > { %4912 = dma.done.wait (%p4558_p9), [#allocation12], 12288  }
  0x3f   : > { %4914 = vsyncadd (%p4558_p9), [#allocation12], 4294955008  ;;  %s3308_s27 = sshll.u32 %s5051_s22, 2  ;;  %v3320_v0 = vld [vmem:[#allocation2] sm:$0xf]  ;;  %vm693_vm0 = vcmask 130048  }
  0x40   : > { %p606_p13 = scmp.lt.s32.totalorder %s3308_s27, 7  ;;  %v4273_v1 = vld [vmem:[#allocation2 + $0x1c] sm:$0xf0]  ;;  %v4269_v2 = vld [vmem:[#allocation2 + $0x4] sm:$0xf]  ;;  %s5457_s24 = sld [smem:[#allocation31_spill]] }
  0x41   : > { %v3321_v3 = vor.u32 %v4273_v1, %v3320_v0  ;;  %v3322_v4 = vld [vmem:[#allocation2 + $0x20] sm:$0xf0]  ;;  %v3328_v7 = vld [vmem:[#allocation2 + $0x8] sm:$0xf]  ;;  %v4270_v9 = vld [vmem:[#allocation2 + $0xc] sm:$0xf] }
  0x42   : > { %s5468_s27 = smov (!%p606_p13, %s3308_s27), 7  ;;  %v3325_v6 = vor.u32 %v4269_v2, %v3322_v4  ;;  %v4274_v8 = vld [vmem:[#allocation2 + $0x24] sm:$0xf0]  ;;  %v3330_v11 = vld [vmem:[#allocation2 + $0x28] sm:$0xf0] }
  0x43   : > { %s3309_s30 = sshll.u32 %s5468_s27, 2  ;;  %707 = vmatpush.bf16.msra.mxu0 %v3321_v3  ;;  %v3329_v10 = vor.u32 %v4274_v8, %v3328_v7  ;;  %v3336_v12 = vld [vmem:[#allocation2 + $0x10] sm:$0xf]  ;;  %v3333_v14 = vor.u32 %v4270_v9, %v3330_v11  ;;  %v4271_v16 = vld [vmem:[#allocation2 + $0x14] sm:$0xf] }
  0x44   : > { %s5163_s25 = scalar_lea.vmem %s5412_s0, %s3309_s30  ;;  %v4275_v13 = vld [vmem:[#allocation2 + $0x2c] sm:$0xf0]  ;;  %726 = vmatpush.bf16.msra.mxu1 %v3325_v6  ;;  %v3338_v17 = vld [vmem:[#allocation2 + $0x30] sm:$0xf0]  ;;  %v3344_v19 = vld [vmem:[#allocation2 + $0x18] sm:$0xf] }
  0x45   : > { %v5166_v5 = vld [vmem:[%s5163_s25] sm:$0xff]  ;;  %v3337_v15 = vor.u32 %v4275_v13, %v3336_v12  ;;  %745 = vmatpush.bf16.msra.mxu2 %v3329_v10  ;;  %v3341_v18 = vor.u32 %v4271_v16, %v3338_v17  ;;  %764 = vmatpush.bf16.msra.mxu3 %v3333_v14  ;;  %v4276_v20 = vld [vmem:[#allocation2 + $0x34] sm:$0xf0]  ;;  %v4272_v21 = vld [vmem:[#allocation2 + $0x1c] sm:$0xf]  ;;  %s602_s30 = sand.u32 1, %s4925_s19  }
  0x46   : > { %3350 = vmatmul.msk.bf16.vlgmr.msra.gmra.mxu0 %vm693_vm0, %v5166_v5  ;;  %v3345_v22 = vor.u32 %v4276_v20, %v3344_v19  ;;  %v3346_v23 = vld [vmem:[#allocation2 + $0x38] sm:$0xf0]  ;;  %v5177_v25 = vld [vmem:[%s5163_s25 + $0x8] sm:$0xff]  ;;  %v4291_v26 = vld [vmem:[#allocation5 + $0x74] sm:$0xf]  ;;  %s3307_s16 = sshll.u32 %s602_s30, 5 }
  0x47   : > { %3352 = vmatmul.msk.bf16.vlgmr.msra.gmra.mxu1 %vm693_vm0, %v5166_v5  ;;  %783 = vmatpush.bf16.msrb.mxu0 %v3337_v15  ;;  %v3349_v24 = vor.u32 %v4272_v21, %v3346_v23  ;;  %v3426_v27 = vld [vmem:[#allocation5 + $0x78] sm:$0xf0]  ;;  %v3424_v28 = vld [vmem:[#allocation5 + $0x70] sm:$0xf]  ;;  %v4292_v30 = vld [vmem:[#allocation5 + $0x74] sm:$0xf0] }
  0x48   : > { %3354 = vmatmul.msk.bf16.vlgmr.msra.gmra.mxu2 %vm693_vm0, %v5166_v5  ;;  %802 = vmatpush.bf16.msrb.mxu1 %v3341_v18  ;;  %v3429_v29 = vor.u32 %v4291_v26, %v3426_v27  ;;  %v3488_v31 = vld [vmem:[#allocation5 + $0xf0] sm:$0xf]  ;;  %v4308_v32 = vld [vmem:[#allocation5 + $0xf4] sm:$0xf0]  ;;  %v3425_v33 = vor.u32 %v4292_v30, %v3424_v28  ;;  %v4307_v35 = vld [vmem:[#allocation5 + $0xf4] sm:$0xf] }
  0x49   : > { %3356 = vmatmul.msk.bf16.vlgmr.msra.gmra.mxu3 %vm693_vm0, %v5166_v5  ;;  %821 = vmatpush.bf16.msrb.mxu2 %v3345_v22  ;;  %v3489_v34 = vor.u32 %v4308_v32, %v3488_v31  ;;  %v3490_v36 = vld [vmem:[#allocation5 + $0xf8] sm:$0xf0]  ;;  %v4289_v37 = vld [vmem:[#allocation5 + $0x64] sm:$0xf]  ;;  %v3418_v39 = vld [vmem:[#allocation5 + $0x68] sm:$0xf0] }
  0x4a   : > { %840 = vmatpush.bf16.msrb.mxu3 %v3349_v24  ;;  %v3493_v38 = vor.u32 %v4307_v35, %v3490_v36  ;;  %v3416_v40 = vld [vmem:[#allocation5 + $0x60] sm:$0xf]  ;;  %v4290_v41 = vld [vmem:[#allocation5 + $0x64] sm:$0xf0]  ;;  %v3421_v42 = vor.u32 %v4289_v37, %v3418_v39  ;;  %v4305_v46 = vld [vmem:[#allocation5 + $0xe4] sm:$0xf] }
  0x4b   : > { %1086 = vmatpush.bf16.msra.mxu0 %v3425_v33  ;;  %v3417_v43 = vor.u32 %v4290_v41, %v3416_v40  ;;  %v3480_v44 = vld [vmem:[#allocation5 + $0xe0] sm:$0xf]  ;;  %v4306_v45 = vld [vmem:[#allocation5 + $0xe4] sm:$0xf0]  ;;  %v3482_v48 = vld [vmem:[#allocation5 + $0xe8] sm:$0xf0] }
  0x4c   : > { %1105 = vmatpush.bf16.msra.mxu1 %v3489_v34  ;;  %v3481_v47 = vor.u32 %v4306_v45, %v3480_v44  ;;  %v4287_v49 = vld [vmem:[#allocation5 + $0x54] sm:$0xf]  ;;  %v3410_v50 = vld [vmem:[#allocation5 + $0x58] sm:$0xf0]  ;;  %v3485_v51 = vor.u32 %v4305_v46, %v3482_v48  ;;  %v3408_v52 = vld [vmem:[#allocation5 + $0x50] sm:$0xf] }
  0x4d   : > { %1124 = vmatpush.bf16.msra.mxu2 %v3429_v29  ;;  %v4288_v53 = vld [vmem:[#allocation5 + $0x54] sm:$0xf0]  ;;  %v3472_v54 = vld [vmem:[#allocation5 + $0xd0] sm:$0xf]  ;;  %v3413_v55 = vor.u32 %v4287_v49, %v3410_v50  ;;  %v4303_v57 = vld [vmem:[#allocation5 + $0xd4] sm:$0xf] }
  0x4e   : > { %1143 = vmatpush.bf16.msra.mxu3 %v3493_v38  ;;  %v4304_v56 = vld [vmem:[#allocation5 + $0xd4] sm:$0xf0]  ;;  %v3474_v58 = vld [vmem:[#allocation5 + $0xd8] sm:$0xf0]  ;;  %v3409_v59 = vor.u32 %v4288_v53, %v3408_v52  ;;  %v4285_v62 = vld [vmem:[#allocation5 + $0x44] sm:$0xf] }
  0x4f   : > { %1087 = vmatpush.bf16.msra.mxu0 %v3417_v43  ;;  %v3473_v60 = vor.u32 %v4304_v56, %v3472_v54  ;;  %v3477_v61 = vor.u32 %v4303_v57, %v3474_v58  ;;  %v3402_v63 = vld [vmem:[#allocation5 + $0x48] sm:$0xf0]  ;;  %v3400_v0 = vld [vmem:[#allocation5 + $0x40] sm:$0xf]  ;;  %v4286_v1 = vld [vmem:[#allocation5 + $0x44] sm:$0xf0] }
  0x50   : > { %1106 = vmatpush.bf16.msra.mxu1 %v3481_v47  ;;  %v3464_v2 = vld [vmem:[#allocation5 + $0xc0] sm:$0xf]  ;;  %v4302_v3 = vld [vmem:[#allocation5 + $0xc4] sm:$0xf0]  ;;  %v4301_v4 = vld [vmem:[#allocation5 + $0xc4] sm:$0xf]  ;;  %v3405_v7 = vor.u32 %v4285_v62, %v3402_v63  ;;  %v3401_v8 = vor.u32 %v4286_v1, %v3400_v0 }
  0x51   : > { %1125 = vmatpush.bf16.msra.mxu2 %v3421_v42  ;;  %v3466_v6 = vld [vmem:[#allocation5 + $0xc8] sm:$0xf0]  ;;  %v3465_v9 = vor.u32 %v4302_v3, %v3464_v2  ;;  %v4283_v10 = vld [vmem:[#allocation5 + $0x34] sm:$0xf]  ;;  %v3394_v11 = vld [vmem:[#allocation5 + $0x38] sm:$0xf0] }
  0x52   : > { %1144 = vmatpush.bf16.msra.mxu3 %v3485_v51  ;;  %v3469_v12 = vor.u32 %v4301_v4, %v3466_v6  ;;  %v3397_v13 = vor.u32 %v4283_v10, %v3394_v11  ;;  %v3392_v14 = vld [vmem:[#allocation5 + $0x30] sm:$0xf]  ;;  %v4300_v17 = vld [vmem:[#allocation5 + $0xb4] sm:$0xf0]  ;;  %v4299_v18 = vld [vmem:[#allocation5 + $0xb4] sm:$0xf] }
  0x53   : > { %1088 = vmatpush.bf16.msra.mxu0 %v3409_v59  ;;  %v3456_v15 = vld [vmem:[#allocation5 + $0xb0] sm:$0xf]  ;;  %v3458_v19 = vld [vmem:[#allocation5 + $0xb8] sm:$0xf0]  ;;  %v4281_v22 = vld [vmem:[#allocation5 + $0x24] sm:$0xf] }
  0x54   : > { %1107 = vmatpush.bf16.msra.mxu1 %v3473_v60  ;;  %v3457_v20 = vor.u32 %v4300_v17, %v3456_v15  ;;  %v3461_v21 = vor.u32 %v4299_v18, %v3458_v19  ;;  %v3386_v23 = vld [vmem:[#allocation5 + $0x28] sm:$0xf0]  ;;  %v3384_v26 = vld [vmem:[#allocation5 + $0x20] sm:$0xf]  ;;  %v4282_v27 = vld [vmem:[#allocation5 + $0x24] sm:$0xf0] }
  0x55   : > { %1126 = vmatpush.bf16.msra.mxu2 %v3413_v55  ;;  %v3389_v24 = vor.u32 %v4281_v22, %v3386_v23  ;;  %v3448_v28 = vld [vmem:[#allocation5 + $0xa0] sm:$0xf]  ;;  %v3385_v29 = vor.u32 %v4282_v27, %v3384_v26  ;;  %v4297_v30 = vld [vmem:[#allocation5 + $0xa4] sm:$0xf]  ;;  %v3450_v31 = vld [vmem:[#allocation5 + $0xa8] sm:$0xf0] }
  0x56   : > { %3351 = vmatmul.msk.bf16.gmra.mxu0 %vm693_vm0, %v5177_v25  ;;  %1145 = vmatpush.bf16.msra.mxu3 %v3477_v61  ;;  %v3453_v33 = vor.u32 %v4297_v30, %v3450_v31  ;;  %v4279_v34 = vld [vmem:[#allocation5 + $0x14] sm:$0xf]  ;;  %v3378_v35 = vld [vmem:[#allocation5 + $0x18] sm:$0xf0]  ;;  %v3376_v37 = vld [vmem:[#allocation5 + $0x10] sm:$0xf] }
  0x57   : > { %3353 = vmatmul.msk.bf16.gmra.mxu1 %vm693_vm0, %v5177_v25  ;;  %1089 = vmatpush.bf16.msra.mxu0 %v3401_v8  ;;  %v3381_v36 = vor.u32 %v4279_v34, %v3378_v35  ;;  %v4280_v38 = vld [vmem:[#allocation5 + $0x14] sm:$0xf0]  ;;  %v3440_v39 = vld [vmem:[#allocation5 + $0x90] sm:$0xf]  ;;  %v4295_v42 = vld [vmem:[#allocation5 + $0x94] sm:$0xf] }
  0x58   : > { %3355 = vmatmul.msk.bf16.gmra.mxu2 %vm693_vm0, %v5177_v25  ;;  %1108 = vmatpush.bf16.msra.mxu1 %v3465_v9  ;;  %v3377_v40 = vor.u32 %v4280_v38, %v3376_v37  ;;  %v4296_v41 = vld [vmem:[#allocation5 + $0x94] sm:$0xf0]  ;;  %v3442_v43 = vld [vmem:[#allocation5 + $0x98] sm:$0xf0]  ;;  %v4277_v46 = vld [vmem:[#allocation5 + $0x4] sm:$0xf] }
  0x59   : > { %3357 = vmatmul.msk.bf16.gmra.mxu3 %vm693_vm0, %v5177_v25  ;;  %1127 = vmatpush.bf16.msra.mxu2 %v3405_v7  ;;  %v3441_v44 = vor.u32 %v4296_v41, %v3440_v39  ;;  %v3445_v45 = vor.u32 %v4295_v42, %v3442_v43  ;;  %v3370_v47 = vld [vmem:[#allocation5 + $0x8] sm:$0xf0]  ;;  %v3368_v48 = vld [vmem:[#allocation5] sm:$0xf]  ;;  %v4278_v50 = vld [vmem:[#allocation5 + $0x4] sm:$0xf0] }
  0x5a   : > { %1146 = vmatpush.bf16.msra.mxu3 %v3469_v12  ;;  %v3373_v49 = vor.u32 %v4277_v46, %v3370_v47  ;;  %v3432_v51 = vld [vmem:[#allocation5 + $0x80] sm:$0xf]  ;;  %v4294_v52 = vld [vmem:[#allocation5 + $0x84] sm:$0xf0]  ;;  %v3369_v53 = vor.u32 %v4278_v50, %v3368_v48  ;;  %v4293_v55 = vld [vmem:[#allocation5 + $0x84] sm:$0xf] }
  0x5b   : > { %v3433_v54 = vor.u32 %v4294_v52, %v3432_v51  ;;  %v3434_v56 = vld [vmem:[#allocation5 + $0x88] sm:$0xf0]  ;;  %v4323_v58 = vld [vmem:[#allocation7 + $0x74] sm:$0xf]  ;;  %v3554_v59 = vld [vmem:[#allocation7 + $0x78] sm:$0xf0] }
  0x5c   : > { %1109 = vmatpush.bf16.msra.mxu1 %v3457_v20  ;;  %v3437_v57 = vor.u32 %v4293_v55, %v3434_v56  ;;  %v3557_v60 = vor.u32 %v4323_v58, %v3554_v59  ;;  %v3552_v61 = vld [vmem:[#allocation7 + $0x70] sm:$0xf]  ;;  %v4324_v62 = vld [vmem:[#allocation7 + $0x74] sm:$0xf0]  ;;  %v4339_v63 = vld [vmem:[#allocation7 + $0xf4] sm:$0xf] }
  0x5d   : > { %1128 = vmatpush.bf16.msra.mxu2 %v3397_v13  ;;  %v3553_v0 = vor.u32 %v4324_v62, %v3552_v61  ;;  %v3618_v1 = vld [vmem:[#allocation7 + $0xf8] sm:$0xf0]  ;;  %v3616_v3 = vld [vmem:[#allocation7 + $0xf0] sm:$0xf]  ;;  %v4340_v4 = vld [vmem:[#allocation7 + $0xf4] sm:$0xf0] }
  0x5e   : > { %1147 = vmatpush.bf16.msra.mxu3 %v3461_v21  ;;  %v3621_v2 = vor.u32 %v4339_v63, %v3618_v1  ;;  %v4321_v6 = vld [vmem:[#allocation7 + $0x64] sm:$0xf]  ;;  %v3617_v7 = vor.u32 %v4340_v4, %v3616_v3  ;;  %v3546_v8 = vld [vmem:[#allocation7 + $0x68] sm:$0xf0]  ;;  %v3544_v10 = vld [vmem:[#allocation7 + $0x60] sm:$0xf] }
  0x5f   : > { %v3549_v9 = vor.u32 %v4321_v6, %v3546_v8  ;;  %v4322_v11 = vld [vmem:[#allocation7 + $0x64] sm:$0xf0]  ;;  %v4337_v12 = vld [vmem:[#allocation7 + $0xe4] sm:$0xf]  ;;  %v3608_v15 = vld [vmem:[#allocation7 + $0xe0] sm:$0xf] }
  0x60   : > { %v3545_v13 = vor.u32 %v4322_v11, %v3544_v10  ;;  %v4319_v17 = vld [vmem:[#allocation7 + $0x54] sm:$0xf]  ;;  %v3538_v19 = vld [vmem:[#allocation7 + $0x58] sm:$0xf0]  ;;  %v3536_v21 = vld [vmem:[#allocation7 + $0x50] sm:$0xf] }
  0x61   : > { %1129 = vmatpush.bf16.msra.mxu2 %v3389_v24  ;;  %v3541_v20 = vor.u32 %v4319_v17, %v3538_v19  ;;  %v4320_v22 = vld [vmem:[#allocation7 + $0x54] sm:$0xf0]  ;;  %v4335_v23 = vld [vmem:[#allocation7 + $0xd4] sm:$0xf]  ;;  %v3602_v26 = vld [vmem:[#allocation7 + $0xd8] sm:$0xf0] }
  0x62   : > { %1148 = vmatpush.bf16.msra.mxu3 %v3453_v33  ;;  %v3537_v24 = vor.u32 %v4320_v22, %v3536_v21  ;;  %v3605_v27 = vor.u32 %v4335_v23, %v3602_v26  ;;  %v3530_v31 = vld [vmem:[#allocation7 + $0x48] sm:$0xf0]  ;;  %v3528_v33 = vld [vmem:[#allocation7 + $0x40] sm:$0xf]  ;;  %v4318_v34 = vld [vmem:[#allocation7 + $0x44] sm:$0xf0] }
  0x63   : > { %v4333_v35 = vld [vmem:[#allocation7 + $0xc4] sm:$0xf]  ;;  %v3594_v37 = vld [vmem:[#allocation7 + $0xc8] sm:$0xf0]  ;;  %v3592_v39 = vld [vmem:[#allocation7 + $0xc0] sm:$0xf] }
  0x64   : > { %v3597_v38 = vor.u32 %v4333_v35, %v3594_v37  ;;  %v4315_v41 = vld [vmem:[#allocation7 + $0x34] sm:$0xf]  ;;  %v3522_v43 = vld [vmem:[#allocation7 + $0x38] sm:$0xf0]  ;;  %v3520_v47 = vld [vmem:[#allocation7 + $0x30] sm:$0xf] }
  0x65   : > { %1130 = vmatpush.bf16.msra.mxu2 %v3381_v36  ;;  %v3529_v36 = vor.u32 %v4318_v34, %v3528_v33  ;;  %v3525_v46 = vor.u32 %v4315_v41, %v3522_v43  ;;  %v4316_v48 = vld [vmem:[#allocation7 + $0x34] sm:$0xf0]  ;;  %v4331_v51 = vld [vmem:[#allocation7 + $0xb4] sm:$0xf]  ;;  %v3586_v52 = vld [vmem:[#allocation7 + $0xb8] sm:$0xf0] }
  0x66   : > { %3358 = vmatmul.msk.bf16.vlgmr.msrb.gmra.mxu0 %vm693_vm0, %v5166_v5  ;;  %1149 = vmatpush.bf16.msra.mxu3 %v3445_v45  ;;  %v3521_v50 = vor.u32 %v4316_v48, %v3520_v47  ;;  %v4332_v55 = vld [vmem:[#allocation7 + $0xb4] sm:$0xf0]  ;;  %v4313_v56 = vld [vmem:[#allocation7 + $0x24] sm:$0xf]  ;;  %v3512_v61 = vld [vmem:[#allocation7 + $0x20] sm:$0xf] }
  0x67   : > { %3360 = vmatmul.msk.bf16.vlgmr.msrb.gmra.mxu1 %vm693_vm0, %v5166_v5  ;;  %v4314_v62 = vld [vmem:[#allocation7 + $0x24] sm:$0xf0]  ;;  %v4329_v1 = vld [vmem:[#allocation7 + $0xa4] sm:$0xf]  ;;  %v3576_v4 = vld [vmem:[#allocation7 + $0xa0] sm:$0xf] }
  0x68   : > { %3362 = vmatmul.msk.bf16.vlgmr.msrb.gmra.mxu2 %vm693_vm0, %v5166_v5  ;;  %v4330_v6 = vld [vmem:[#allocation7 + $0xa4] sm:$0xf0]  ;;  %v3504_v10 = vld [vmem:[#allocation7 + $0x10] sm:$0xf]  ;;  %v4312_v11 = vld [vmem:[#allocation7 + $0x14] sm:$0xf0] }
  0x69   : > { %3364 = vmatmul.msk.bf16.vlgmr.msrb.gmra.mxu3 %vm693_vm0, %v5166_v5  ;;  %v4284_v5 = vld [vmem:[#allocation5 + $0x34] sm:$0xf0]  ;;  %1131 = vmatpush.bf16.msra.mxu2 %v3373_v49  ;;  %v3577_v8 = vor.u32 %v4330_v6, %v3576_v4  ;;  %v4309_v21 = vld [vmem:[#allocation7 + $0x4] sm:$0xf]  ;;  %v3498_v22 = vld [vmem:[#allocation7 + $0x8] sm:$0xf0] }
  0x6a   : > { %v3393_v16 = vor.u32 %v4284_v5, %v3392_v14  ;;  %1150 = vmatpush.bf16.msra.mxu3 %v3437_v57  ;;  %v3610_v14 = vld [vmem:[#allocation7 + $0xe8] sm:$0xf0]  ;;  %v4326_v41 = vld [vmem:[#allocation7 + $0x84] sm:$0xf0]  ;;  %s604_s17 = scalar_lea.vmem [#allocation14], %s3307_s16  ;;  %s4501_s25 = sshll.u32 %s5051_s22, 5 }
  0x6b   : > { %v3613_v5 = vor.u32 %v4337_v12, %v3610_v14  ;;  %v3514_v57 = vld [vmem:[#allocation7 + $0x28] sm:$0xf0]  ;;  %v3505_v14 = vor.u32 %v4312_v11, %v3504_v10  ;;  %v4351_v10 = vld [vmem:[#allocation8 + $0x54] sm:$0xf]  ;;  %v3666_v11 = vld [vmem:[#allocation8 + $0x58] sm:$0xf0]  ;;  %s3154_s7 = scalar_lea.hbm %s5457_s24, %s4501_s25 }
  0x6c   : > { %1090 = vmatpush.bf16.msra.mxu0 %v3393_v16  ;;  %v4338_v16 = vld [vmem:[#allocation7 + $0xe4] sm:$0xf0]  ;;  %v3738_v6 = vld [vmem:[#allocation8 + $0xe8] sm:$0xf0]  ;;  %s3155_s23 = sshll.u32 %s604_s17, 4  ;;  %s3157_s18 = sshll.u32 %s3154_s7, 4  ;;  %s3156_s23 = int_to_ptr.vmem [resolvable:$true] %s3155_s23  ;;  %s3158_s18 = int_to_ptr.hbm [resolvable:$true] %s3157_s18 }
  0x6d   : > { %1410 = vmatpush.bf16.msrb.mxu2 %v3557_v60  ;;  %v3609_v18 = vor.u32 %v4338_v16, %v3608_v15  ;;  %v3517_v60 = vor.u32 %v4313_v56, %v3514_v57  ;;  %v3570_v15 = vld [vmem:[#allocation7 + $0x98] sm:$0xf0]  ;;  %v3568_v16 = vld [vmem:[#allocation7 + $0x90] sm:$0xf]  ;;  %v4372_v56 = vld [vmem:[#allocation8 + $0xf4] sm:$0xf0] }
  0x6e   : > { %1429 = vmatpush.bf16.msrb.mxu3 %v3621_v2  ;;  %v3578_v2 = vld [vmem:[#allocation7 + $0xa8] sm:$0xf0]  ;;  %s3143_s22 = scalar_lea.sflag [#allocation4], %s602_s30  ;;  %s4869_s21 = sshra.s32 %s3158_s18, 4  ;;  %s4870_s21 = int_to_ptr.hbm [resolvable:$true] %s4869_s21 }
  0x6f   : > { %v3581_v3 = vor.u32 %v4329_v1, %v3578_v2  ;;  %v4354_v2 = vld [vmem:[#allocation8 + $0x64] sm:$0xf0]  ;;  %s4871_s26 = scalar_lea.hbm %s4870_s21, 32  ;;  %s4875_s3 = scalar_lea.hbm %s5457_s24, 64 }
  0x70   : > { %1091 = vmatpush.bf16.msra.mxu0 %v3385_v29  ;;  %v4336_v29 = vld [vmem:[#allocation7 + $0xd4] sm:$0xf0]  ;;  %p4872_p0 = scmp.ne.s32.totalorder %s4870_s21, %s4871_s26  ;;  %p4876_p3 = scmp.lt.s32.totalorder %s4870_s21, %s5457_s24 }
  0x71   : > { %1411 = vmatpush.bf16.msrb.mxu2 %v3549_v9  ;;  %v3506_v9 = vld [vmem:[#allocation7 + $0x18] sm:$0xf0]  ;;  %p4877_p4 = scmp.lt.s32.totalorder %s4875_s3, %s4871_s26 }
  0x72   : > { %1430 = vmatpush.bf16.msrb.mxu3 %v3613_v5  ;;  %v4327_v5 = vld [vmem:[#allocation7 + $0x94] sm:$0xf]  ;;  %p4873_p1 = pnand %p4872_p0, %p5068_p5 }
  0x73   : > { %v3573_v19 = vor.u32 %v4327_v5, %v3570_v15  ;;  %v4352_v5 = vld [vmem:[#allocation8 + $0x54] sm:$0xf0]  ;;  %v4367_v15 = vld [vmem:[#allocation8 + $0xd4] sm:$0xf]  ;;  %p4878_p7 = por %p4877_p4, %p4876_p3 }
  0x74   : > { %1092 = vmatpush.bf16.msra.mxu0 %v3377_v40  ;;  %v4334_v40 = vld [vmem:[#allocation7 + $0xc4] sm:$0xf0]  ;;  %p4874_p2 = pneg %p4873_p1 }
  0x75   : > { %1412 = vmatpush.bf16.msrb.mxu2 %v3541_v20  ;;  %v3593_v42 = vor.u32 %v4334_v40, %v3592_v39  ;;  %v4328_v20 = vld [vmem:[#allocation7 + $0x94] sm:$0xf0]  ;;  %v3560_v40 = vld [vmem:[#allocation7 + $0x80] sm:$0xf] }
  0x76   : > { %3359 = vmatmul.msk.bf16.gmra.mxu0 %vm693_vm0, %v5177_v25  ;;  %1431 = vmatpush.bf16.msrb.mxu3 %v3605_v27  ;;  %v3569_v26 = vor.u32 %v4328_v20, %v3568_v16  ;;  %v3496_v27 = vld [vmem:[#allocation7] sm:$0xf]  ;;  %v4368_v20 = vld [vmem:[#allocation8 + $0xd4] sm:$0xf0]  ;;  %p4879_p8 = pnand %p4878_p7, %p4874_p2 }
  0x77   : > { %3361 = vmatmul.msk.bf16.gmra.mxu1 %vm693_vm0, %v5177_v25 }
  0x78   : > { %3363 = vmatmul.msk.bf16.gmra.mxu2 %vm693_vm0, %v5177_v25  ;;  %1093 = vmatpush.bf16.msra.mxu0 %v3369_v53  ;;  %v3584_v53 = vld [vmem:[#allocation7 + $0xb0] sm:$0xf] }
  0x79   : > { %3365 = vmatmul.msk.bf16.gmra.mxu3 %vm693_vm0, %v5177_v25  ;;  %v4298_v25 = vld [vmem:[#allocation5 + $0xa4] sm:$0xf0]  ;;  %v3585_v59 = vor.u32 %v4332_v55, %v3584_v53  ;;  %v3744_v55 = vld [vmem:[#allocation8 + $0xf0] sm:$0xf] }
  0x7a   : > { %v3449_v32 = vor.u32 %v4298_v25, %v3448_v28  ;;  %v3600_v28 = vld [vmem:[#allocation7 + $0xd0] sm:$0xf]  ;;  %v4317_v25 = vld [vmem:[#allocation7 + $0x44] sm:$0xf]  ;;  %1432 = vmatpush.bf16.msrb.mxu3 %v3597_v38 }
  0x7b   : > { %v3601_v30 = vor.u32 %v4336_v29, %v3600_v28  ;;  %v3501_v29 = vor.u32 %v4309_v21, %v3498_v22 }
  0x7c   : > { %1110 = vmatpush.bf16.msra.mxu1 %v3449_v32  ;;  %1372 = vmatpush.bf16.msrb.mxu0 %v3553_v0  ;;  %v3533_v32 = vor.u32 %v4317_v25, %v3530_v31  ;;  %v3513_v0 = vor.u32 %v4314_v62, %v3512_v61  ;;  %v4310_v25 = vld [vmem:[#allocation7 + $0x4] sm:$0xf0]  ;;  %v3562_v31 = vld [vmem:[#allocation7 + $0x88] sm:$0xf0]  ;;  %v3672_v61 = vld [vmem:[#allocation8 + $0x60] sm:$0xf] }
  0x7d   : > { %v3497_v37 = vor.u32 %v4310_v25, %v3496_v27  ;;  %v3673_v4 = vor.u32 %v4354_v2, %v3672_v61  ;;  %v3714_v61 = vld [vmem:[#allocation8 + $0xb8] sm:$0xf0]  ;;  %v4345_v2 = vld [vmem:[#allocation8 + $0x24] sm:$0xf] }
  0x7e   : > { %1413 = vmatpush.bf16.msrb.mxu2 %v3533_v32 }
  0x80   : > { %1111 = vmatpush.bf16.msra.mxu1 %v3441_v44  ;;  %1373 = vmatpush.bf16.msrb.mxu0 %v3545_v13  ;;  %v5206_v44 = vld [vmem:[%s5414_s2] sm:$0xff] }
  0x81   : > { %v5209_v58 = vperm.slane %v5206_v44, 0  ;;  %v5212_v63 = vperm.slane %v5206_v44, 1 }
  0x82   : > { %1414 = vmatpush.bf16.msrb.mxu2 %v3525_v46  ;;  %v3682_v46 = vld [vmem:[#allocation8 + $0x78] sm:$0xf0] }
  0x84   : > { %1112 = vmatpush.bf16.msra.mxu1 %v3433_v54  ;;  %1374 = vmatpush.bf16.msrb.mxu0 %v3537_v24  ;;  %v3589_v54 = vor.u32 %v4331_v51, %v3586_v52  ;;  %v4371_v51 = vld [vmem:[#allocation8 + $0xf4] sm:$0xf] }
  0x86   : > { %1433 = vmatpush.bf16.msrb.mxu3 %v3589_v54  ;;  %1415 = vmatpush.bf16.msrb.mxu2 %v3517_v60  ;;  %v3746_v54 = vld [vmem:[#allocation8 + $0xf8] sm:$0xf0]  ;;  %v3674_v60 = vld [vmem:[#allocation8 + $0x68] sm:$0xf0] }
  0x87   : > { %v3749_v57 = vor.u32 %v4371_v51, %v3746_v54 }
  0x88   : > { %1391 = vmatpush.bf16.msrb.mxu1 %v3617_v7  ;;  %1375 = vmatpush.bf16.msrb.mxu0 %v3529_v36  ;;  %v4311_v7 = vld [vmem:[#allocation7 + $0x14] sm:$0xf] }
  0x89   : > { %v3509_v13 = vor.u32 %v4311_v7, %v3506_v9  ;;  %v3736_v7 = vld [vmem:[#allocation8 + $0xe0] sm:$0xf]  ;;  %v4370_v9 = vld [vmem:[#allocation8 + $0xe4] sm:$0xf0] }
  0x8a   : > { %1434 = vmatpush.bf16.msrb.mxu3 %v3581_v3  ;;  %v4369_v3 = vld [vmem:[#allocation8 + $0xe4] sm:$0xf] }
  0x8b   : > { %1416 = vmatpush.bf16.msrb.mxu2 %v3509_v13  ;;  %v3669_v13 = vor.u32 %v4351_v10, %v3666_v11  ;;  %v3640_v10 = vld [vmem:[#allocation8 + $0x20] sm:$0xf]  ;;  %v4346_v11 = vld [vmem:[#allocation8 + $0x24] sm:$0xf0] }
  0x8c   : > { %1392 = vmatpush.bf16.msrb.mxu1 %v3609_v18  ;;  %1376 = vmatpush.bf16.msrb.mxu0 %v3521_v50  ;;  %v4356_v50 = vld [vmem:[#allocation8 + $0x74] sm:$0xf0] }
  0x8e   : > { %1435 = vmatpush.bf16.msrb.mxu3 %v3573_v19  ;;  %v3728_v19 = vld [vmem:[#allocation8 + $0xd0] sm:$0xf] }
  0x8f   : > { %1417 = vmatpush.bf16.msrb.mxu2 %v3501_v29  ;;  %v3729_v25 = vor.u32 %v4368_v20, %v3728_v19  ;;  %v4343_v19 = vld [vmem:[#allocation8 + $0x14] sm:$0xf] }
  0x90   : > { %1393 = vmatpush.bf16.msrb.mxu1 %v3601_v30  ;;  %1377 = vmatpush.bf16.msrb.mxu0 %v3513_v0  ;;  %v4325_v30 = vld [vmem:[#allocation7 + $0x84] sm:$0xf]  ;;  %v3745_v0 = vor.u32 %v4372_v56, %v3744_v55 }
  0x91   : > { %v3565_v38 = vor.u32 %v4325_v30, %v3562_v31  ;;  %v3656_v30 = vld [vmem:[#allocation8 + $0x40] sm:$0xf] }
  0x93   : > { %1436 = vmatpush.bf16.msrb.mxu3 %v3565_v38  ;;  %v5227_v38 = vperm.slane %v5206_v44, 2 }
  0x94   : > { %1394 = vmatpush.bf16.msrb.mxu1 %v3593_v42  ;;  %1378 = vmatpush.bf16.msrb.mxu0 %v3505_v14  ;;  %v4355_v42 = vld [vmem:[#allocation8 + $0x74] sm:$0xf]  ;;  %v3664_v14 = vld [vmem:[#allocation8 + $0x50] sm:$0xf] }
  0x95   : > { %v3685_v48 = vor.u32 %v4355_v42, %v3682_v46 }
  0x98   : > { %1395 = vmatpush.bf16.msrb.mxu1 %v3585_v59  ;;  %1379 = vmatpush.bf16.msrb.mxu0 %v3497_v37  ;;  %v4353_v59 = vld [vmem:[#allocation8 + $0x64] sm:$0xf] }
  0x99   : > { %v3677_v1 = vor.u32 %v4353_v59, %v3674_v60  ;;  %v4348_v59 = vld [vmem:[#allocation8 + $0x34] sm:$0xf0] }
  0x9c   : > { %1396 = vmatpush.bf16.msrb.mxu1 %v3577_v8  ;;  %v3741_v8 = vor.u32 %v4369_v3, %v3738_v6  ;;  %v3642_v3 = vld [vmem:[#allocation8 + $0x28] sm:$0xf0] }
  0xa0   : > { %1397 = vmatpush.bf16.msrb.mxu1 %v3569_v26  ;;  %v3658_v26 = vld [vmem:[#allocation8 + $0x48] sm:$0xf0] }
  0xc3   : > { %v709_v45 = vpop.f32.mrf.mxu0 }
  0xc4   : > { %v728_v49 = vpop.f32.mrf.mxu1  ;;  %v710_v12 = vadd.f32 %v709_v45, %v5209_v58  ;;  %v3561_v45 = vor.u32 %v4326_v41, %v3560_v40 }
  0xc5   : > { %v729_v17 = vadd.f32 %v728_v49, %v5212_v63  ;;  %v3680_v49 = vld [vmem:[#allocation8 + $0x70] sm:$0xf] }
  0xc6   : > { %v852_v32 = vmax.f32 %v710_v12, 0.0  ;;  %v3681_v53 = vor.u32 %v4356_v50, %v3680_v49  ;;  %1398 = vmatpush.bf16.msrb.mxu1 %v3561_v45  ;;  %v3737_v12 = vor.u32 %v4370_v9, %v3736_v7  ;;  %v4347_v49 = vld [vmem:[#allocation8 + $0x34] sm:$0xf]  ;;  %v3645_v9 = vor.u32 %v4345_v2, %v3642_v3  ;;  %v4385_v3 = vld [vmem:[#allocation10 + $0x64] sm:$0xf] }
  0xc7   : > { %v853_v34 = vmax.f32 %v729_v17, 0.0  ;;  %v3665_v17 = vor.u32 %v4352_v5, %v3664_v14  ;;  %v4361_v14 = vld [vmem:[#allocation8 + $0xa4] sm:$0xf]  ;;  %v3706_v5 = vld [vmem:[#allocation8 + $0xa8] sm:$0xf0] }
  0xcb   : > { %v711_v18 = vpop.f32.mrf.mxu0  ;;  %v5218_v43 = vpop.f32.mrf.mxu2 }
  0xcc   : > { %v712_v23 = vadd.f32 %v711_v18, %v5209_v58  ;;  %v730_v24 = vpop.f32.mrf.mxu1  ;;  %v5220_v62 = vpop.f32.mrf.mxu3  ;;  %v3730_v18 = vld [vmem:[#allocation8 + $0xd8] sm:$0xf0]  ;;  %v5234_v50 = vadd.f32 %v5218_v43, %v5227_v38  ;;  %v4363_v43 = vld [vmem:[#allocation8 + $0xb4] sm:$0xf] }
  0xcd   : > { %v731_v28 = vadd.f32 %v730_v24, %v5212_v63  ;;  %v4349_v24 = vld [vmem:[#allocation8 + $0x44] sm:$0xf] }
  0xce   : > { %v860_v33 = vmax.f32 %v712_v23, 0.0  ;;  %v3733_v23 = vor.u32 %v4367_v15, %v3730_v18  ;;  %v3641_v15 = vor.u32 %v4346_v11, %v3640_v10  ;;  %v4362_v18 = vld [vmem:[#allocation8 + $0xa4] sm:$0xf0]  ;;  %v4401_v10 = vld [vmem:[#allocation10 + $0xe4] sm:$0xf] }
  0xcf   : > { %v861_v35 = vmax.f32 %v731_v28, 0.0 }
  0xd0   : > { %v884_v36 = vpack.c.bf16 %v860_v33, %v852_v32  ;;  %v3661_v32 = vor.u32 %v4349_v24, %v3658_v26  ;;  %v4350_v33 = vld [vmem:[#allocation8 + $0x44] sm:$0xf0] }
  0xd1   : > { %v885_v39 = vpack.c.bf16 %v861_v35, %v853_v34  ;;  %v4365_v34 = vld [vmem:[#allocation8 + $0xc4] sm:$0xf]  ;;  %v3722_v35 = vld [vmem:[#allocation8 + $0xc8] sm:$0xf0] }
  0xd2   : > { %1094 = vmatmul.bf16.vlgmr.msra.gmra.mxu0 %v884_v36  ;;  %1132 = vmatmul.bf16.vlgmr.msra.gmra.mxu2 %v884_v36  ;;  %v3725_v45 = vor.u32 %v4365_v34, %v3722_v35  ;;  %v3624_v34 = vld [vmem:[#allocation8] sm:$0xf] }
  0xd3   : > { %1113 = vmatmul.bf16.vlgmr.msra.gmra.mxu1 %v885_v39  ;;  %1151 = vmatmul.bf16.vlgmr.msra.gmra.mxu3 %v885_v39  ;;  %v714_v47 = vpop.f32.mrf.mxu0  ;;  %v749_v29 = vpop.f32.mrf.mxu2  ;;  %v5230_v39 = vperm.slane %v5206_v44, 3 }
  0xd4   : > { %v733_v52 = vpop.f32.mrf.mxu1  ;;  %1696 = vmatpush.bf16.msra.mxu2 %v3685_v48  ;;  %1658 = vmatpush.bf16.msra.mxu0 %v3681_v53  ;;  %v715_v16 = vadd.f32 %v714_v47, %v5209_v58  ;;  %v768_v42 = vpop.f32.mrf.mxu3  ;;  %v3720_v47 = vld [vmem:[#allocation8 + $0xc0] sm:$0xf]  ;;  %v4366_v48 = vld [vmem:[#allocation8 + $0xc4] sm:$0xf0]  ;;  %v3650_v53 = vld [vmem:[#allocation8 + $0x38] sm:$0xf0]  ;;  %v750_v54 = vadd.f32 %v749_v29, %v5227_v38 }
  0xd5   : > { %1715 = vmatpush.bf16.msra.mxu3 %v3749_v57  ;;  %1677 = vmatpush.bf16.msra.mxu1 %v3745_v0  ;;  %v734_v21 = vadd.f32 %v733_v52, %v5212_v63  ;;  %v5238_v51 = vadd.f32 %v5220_v62, %v5230_v39  ;;  %v3721_v52 = vor.u32 %v4366_v48, %v3720_v47  ;;  %v3648_v57 = vld [vmem:[#allocation8 + $0x30] sm:$0xf]  ;;  %v3688_v47 = vld [vmem:[#allocation8 + $0x80] sm:$0xf]  ;;  %v4358_v48 = vld [vmem:[#allocation8 + $0x84] sm:$0xf0] }
  0xd6   : > { %v868_v36 = vmax.f32 %v715_v16, 0.0  ;;  %v769_v55 = vadd.f32 %v768_v42, %v5230_v39  ;;  %v3653_v56 = vor.u32 %v4347_v49, %v3650_v53  ;;  %v3649_v60 = vor.u32 %v4348_v59, %v3648_v57  ;;  %v3712_v0 = vld [vmem:[#allocation8 + $0xb0] sm:$0xf]  ;;  %v4387_v49 = vld [vmem:[#allocation10 + $0x74] sm:$0xf] }
  0xd7   : > { %v3717_v62 = vor.u32 %v4363_v43, %v3714_v61  ;;  %v855_v6 = vmax.f32 %v5238_v51, 0.0  ;;  %v3709_v16 = vor.u32 %v4361_v14, %v3706_v5  ;;  %v3696_v29 = vld [vmem:[#allocation8 + $0x90] sm:$0xf]  ;;  %v3810_v51 = vld [vmem:[#allocation10 + $0x78] sm:$0xf0] }
  0xd8   : > { %1697 = vmatpush.bf16.msra.mxu2 %v3677_v1  ;;  %1659 = vmatpush.bf16.msra.mxu0 %v3673_v4  ;;  %v4364_v1 = vld [vmem:[#allocation8 + $0xb4] sm:$0xf0]  ;;  %v854_v4 = vmax.f32 %v5234_v50, 0.0  ;;  %v3689_v50 = vor.u32 %v4358_v48, %v3688_v47  ;;  %v4403_v57 = vld [vmem:[#allocation10 + $0xf4] sm:$0xf] }
  0xd9   : > { %1716 = vmatpush.bf16.msra.mxu3 %v3741_v8  ;;  %1678 = vmatpush.bf16.msra.mxu1 %v3737_v12  ;;  %v3713_v8 = vor.u32 %v4364_v1, %v3712_v0  ;;  %v862_v12 = vmax.f32 %v750_v54, 0.0  ;;  %v3813_v54 = vor.u32 %v4387_v49, %v3810_v51  ;;  %v3874_v43 = vld [vmem:[#allocation10 + $0xf8] sm:$0xf0]  ;;  %v3872_v61 = vld [vmem:[#allocation10 + $0xf0] sm:$0xf] }
  0xda   : > { %v4404_v0 = vld [vmem:[#allocation10 + $0xf4] sm:$0xf0]  ;;  %v3877_v1 = vor.u32 %v4403_v57, %v3874_v43  ;;  %v3866_v5 = vld [vmem:[#allocation10 + $0xe8] sm:$0xf0]  ;;  %v3848_v49 = vld [vmem:[#allocation10 + $0xc0] sm:$0xf] }
  0xdb   : > { %v716_v22 = vpop.f32.mrf.mxu0  ;;  %v752_v7 = vpop.f32.mrf.mxu2  ;;  %v3873_v2 = vor.u32 %v4404_v0, %v3872_v61  ;;  %v4379_v51 = vld [vmem:[#allocation10 + $0x34] sm:$0xf]  ;;  %v4380_v43 = vld [vmem:[#allocation10 + $0x34] sm:$0xf0] }
  0xdc   : > { %v717_v27 = vadd.f32 %v716_v22, %v5209_v58  ;;  %v735_v28 = vpop.f32.mrf.mxu1  ;;  %1698 = vmatpush.bf16.msra.mxu2 %v3669_v13  ;;  %1660 = vmatpush.bf16.msra.mxu0 %v3665_v17  ;;  %v869_v58 = vmax.f32 %v734_v21, 0.0  ;;  %v863_v13 = vmax.f32 %v769_v55, 0.0  ;;  %v3704_v17 = vld [vmem:[#allocation8 + $0xa0] sm:$0xf]  ;;  %v3634_v21 = vld [vmem:[#allocation8 + $0x18] sm:$0xf0]  ;;  %v771_v24 = vpop.f32.mrf.mxu3 }
  0xdd   : > { %v736_v31 = vadd.f32 %v735_v28, %v5212_v63  ;;  %1717 = vmatpush.bf16.msra.mxu3 %v3733_v23  ;;  %1679 = vmatpush.bf16.msra.mxu1 %v3729_v25  ;;  %v3657_v63 = vor.u32 %v4350_v33, %v3656_v30  ;;  %v3705_v20 = vor.u32 %v4362_v18, %v3704_v17  ;;  %v3632_v22 = vld [vmem:[#allocation8 + $0x10] sm:$0xf]  ;;  %v4344_v23 = vld [vmem:[#allocation8 + $0x14] sm:$0xf0]  ;;  %v3698_v28 = vld [vmem:[#allocation8 + $0x98] sm:$0xf0] }
  0xde   : > { %v876_v37 = vmax.f32 %v717_v27, 0.0  ;;  %v3637_v26 = vor.u32 %v4343_v19, %v3634_v21  ;;  %v4359_v27 = vld [vmem:[#allocation8 + $0x94] sm:$0xf]  ;;  %v4360_v25 = vld [vmem:[#allocation8 + $0x94] sm:$0xf0]  ;;  %v1171_v42 = vpack.c.bf16 %v863_v13, %v855_v6  ;;  %v772_v6 = vadd.f32 %v771_v24, %v5230_v39 }
  0xdf   : > { %v877_v40 = vmax.f32 %v736_v31, 0.0  ;;  %v4341_v30 = vld [vmem:[#allocation8 + $0x4] sm:$0xf]  ;;  %v3626_v31 = vld [vmem:[#allocation8 + $0x8] sm:$0xf0]  ;;  %v3701_v33 = vor.u32 %v4359_v27, %v3698_v28  ;;  %v3697_v35 = vor.u32 %v4360_v25, %v3696_v29 }
  0xe0   : > { %v886_v41 = vpack.c.bf16 %v876_v37, %v868_v36  ;;  %1699 = vmatpush.bf16.msra.mxu2 %v3661_v32  ;;  %1661 = vmatpush.bf16.msra.mxu0 %v3657_v63  ;;  %v3633_v32 = vor.u32 %v4344_v23, %v3632_v22  ;;  %v3629_v36 = vor.u32 %v4341_v30, %v3626_v31  ;;  %v4342_v37 = vld [vmem:[#allocation8 + $0x4] sm:$0xf0]  ;;  %v3808_v55 = vld [vmem:[#allocation10 + $0x70] sm:$0xf]  ;;  %v4383_v18 = vld [vmem:[#allocation10 + $0x54] sm:$0xf] }
  0xe1   : > { %v887_v46 = vpack.c.bf16 %v877_v40, %v869_v58  ;;  %1718 = vmatpush.bf16.msra.mxu3 %v3725_v45  ;;  %1680 = vmatpush.bf16.msra.mxu1 %v3721_v52  ;;  %v4357_v58 = vld [vmem:[#allocation8 + $0x84] sm:$0xf]  ;;  %v3690_v40 = vld [vmem:[#allocation8 + $0x88] sm:$0xf0]  ;;  %v3625_v45 = vor.u32 %v4342_v37, %v3624_v34  ;;  %v5245_v52 = vadd.f32 %v752_v7, %v5227_v38  ;;  %v4402_v17 = vld [vmem:[#allocation10 + $0xe4] sm:$0xf0] }
  0xe2   : > { %1099 = vmatmul.bf16.gmra.mxu0 %v886_v41  ;;  %1137 = vmatmul.bf16.gmra.mxu2 %v886_v41  ;;  %v1170_v41 = vpack.c.bf16 %v862_v12, %v854_v4  ;;  %v3800_v4 = vld [vmem:[#allocation10 + $0x60] sm:$0xf]  ;;  %v3794_v19 = vld [vmem:[#allocation10 + $0x58] sm:$0xf0]  ;;  %v3792_v22 = vld [vmem:[#allocation10 + $0x50] sm:$0xf] }
  0xe3   : > { %1118 = vmatmul.bf16.gmra.mxu1 %v887_v46  ;;  %1156 = vmatmul.bf16.gmra.mxu3 %v887_v46  ;;  %v754_v63 = vpop.f32.mrf.mxu2  ;;  %v3693_v46 = vor.u32 %v4357_v58, %v3690_v40  ;;  %v870_v11 = vmax.f32 %v5245_v52, 0.0  ;;  %v3797_v21 = vor.u32 %v4383_v18, %v3794_v19  ;;  %v4384_v23 = vld [vmem:[#allocation10 + $0x54] sm:$0xf0]  ;;  %v4399_v24 = vld [vmem:[#allocation10 + $0xd4] sm:$0xf]  ;;  %v871_v29 = vmax.f32 %v772_v6, 0.0 }
  0xe4   : > { %1700 = vmatpush.bf16.msra.mxu2 %v3653_v56  ;;  %1662 = vmatpush.bf16.msra.mxu0 %v3649_v60  ;;  %v5248_v53 = vadd.f32 %v754_v63, %v5227_v38  ;;  %v4388_v56 = vld [vmem:[#allocation10 + $0x74] sm:$0xf0]  ;;  %v773_v59 = vpop.f32.mrf.mxu3  ;;  %v3802_v38 = vld [vmem:[#allocation10 + $0x68] sm:$0xf0]  ;;  %v804_v7 = vpop.f32.mrf.mxu1  ;;  %v3858_v27 = vld [vmem:[#allocation10 + $0xd8] sm:$0xf0] }
  0xe5   : > { %1719 = vmatpush.bf16.msra.mxu3 %v3717_v62  ;;  %1681 = vmatpush.bf16.msra.mxu1 %v3713_v8  ;;  %v3809_v60 = vor.u32 %v4388_v56, %v3808_v55  ;;  %v5250_v62 = vpop.f32.mrf.mxu0  ;;  %v3805_v8 = vor.u32 %v4385_v3, %v3802_v38  ;;  %v774_v13 = vadd.f32 %v773_v59, %v5230_v39  ;;  %v3856_v28 = vld [vmem:[#allocation10 + $0xd0] sm:$0xf]  ;;  %v4400_v39 = vld [vmem:[#allocation10 + $0xd4] sm:$0xf0]  ;;  %v3784_v34 = vld [vmem:[#allocation10 + $0x40] sm:$0xf] }
  0xe6   : > { %v878_v12 = vmax.f32 %v5248_v53, 0.0  ;;  %v3861_v30 = vor.u32 %v4399_v24, %v3858_v27  ;;  %v3857_v31 = vor.u32 %v4400_v39, %v3856_v28  ;;  %v4397_v37 = vld [vmem:[#allocation10 + $0xc4] sm:$0xf]  ;;  %v3850_v58 = vld [vmem:[#allocation10 + $0xc8] sm:$0xf0] }
  0xe7   : > { %v879_v25 = vmax.f32 %v774_v13, 0.0  ;;  %v3853_v48 = vor.u32 %v4397_v37, %v3850_v58  ;;  %v3778_v55 = vld [vmem:[#allocation10 + $0x38] sm:$0xf0]  ;;  %v4395_v0 = vld [vmem:[#allocation10 + $0xb4] sm:$0xf] }
  0xe8   : > { %1701 = vmatpush.bf16.msra.mxu2 %v3645_v9  ;;  %1663 = vmatpush.bf16.msra.mxu0 %v3641_v15  ;;  %v4386_v9 = vld [vmem:[#allocation10 + $0x64] sm:$0xf0]  ;;  %v3864_v15 = vld [vmem:[#allocation10 + $0xe0] sm:$0xf]  ;;  %v1172_v40 = vpack.c.bf16 %v878_v12, %v870_v11  ;;  %v3781_v59 = vor.u32 %v4379_v51, %v3778_v55  ;;  %v4396_v3 = vld [vmem:[#allocation10 + $0xb4] sm:$0xf0] }
  0xe9   : > { %1720 = vmatpush.bf16.msra.mxu3 %v3709_v16  ;;  %1682 = vmatpush.bf16.msra.mxu1 %v3705_v20  ;;  %v3801_v14 = vor.u32 %v4386_v9, %v3800_v4  ;;  %v3869_v16 = vor.u32 %v4401_v10, %v3866_v5  ;;  %v3865_v20 = vor.u32 %v4402_v17, %v3864_v15  ;;  %v4377_v38 = vld [vmem:[#allocation10 + $0x24] sm:$0xf]  ;;  %v3770_v4 = vld [vmem:[#allocation10 + $0x28] sm:$0xf0]  ;;  %v3768_v10 = vld [vmem:[#allocation10 + $0x20] sm:$0xf] }
  0xea   : > { %v1173_v63 = vpack.c.bf16 %v879_v25, %v871_v29  ;;  %v3773_v9 = vor.u32 %v4377_v38, %v3770_v4  ;;  %v4378_v11 = vld [vmem:[#allocation10 + $0x24] sm:$0xf0]  ;;  %v3834_v5 = vld [vmem:[#allocation10 + $0xa8] sm:$0xf0]  ;;  %v3832_v17 = vld [vmem:[#allocation10 + $0xa0] sm:$0xf] }
  0xeb   : > { %v3769_v15 = vor.u32 %v4378_v11, %v3768_v10  ;;  %v4394_v18 = vld [vmem:[#allocation10 + $0xa4] sm:$0xf0]  ;;  %v4375_v19 = vld [vmem:[#allocation10 + $0x14] sm:$0xf]  ;;  %v4376_v24 = vld [vmem:[#allocation10 + $0x14] sm:$0xf0] }
  0xec   : > { %1702 = vmatpush.bf16.msra.mxu2 %v3637_v26  ;;  %1664 = vmatpush.bf16.msra.mxu0 %v3633_v32  ;;  %v3793_v26 = vor.u32 %v4384_v23, %v3792_v22  ;;  %v4381_v32 = vld [vmem:[#allocation10 + $0x44] sm:$0xf]  ;;  %v3762_v22 = vld [vmem:[#allocation10 + $0x18] sm:$0xf0]  ;;  %v3760_v23 = vld [vmem:[#allocation10 + $0x10] sm:$0xf] }
  0xed   : > { %1721 = vmatpush.bf16.msra.mxu3 %v3701_v33  ;;  %1683 = vmatpush.bf16.msra.mxu1 %v3697_v35  ;;  %v3786_v33 = vld [vmem:[#allocation10 + $0x48] sm:$0xf0]  ;;  %v3765_v27 = vor.u32 %v4375_v19, %v3762_v22  ;;  %v4391_v28 = vld [vmem:[#allocation10 + $0x94] sm:$0xf]  ;;  %v3826_v39 = vld [vmem:[#allocation10 + $0x98] sm:$0xf0] }
  0xee   : > { %v3789_v35 = vor.u32 %v4381_v32, %v3786_v33  ;;  %v3824_v29 = vld [vmem:[#allocation10 + $0x90] sm:$0xf]  ;;  %v4392_v25 = vld [vmem:[#allocation10 + $0x94] sm:$0xf0]  ;;  %v3761_v32 = vor.u32 %v4376_v24, %v3760_v23  ;;  %v3829_v33 = vor.u32 %v4391_v28, %v3826_v39  ;;  %v4374_v37 = vld [vmem:[#allocation10 + $0x4] sm:$0xf0] }
  0xef   : > { %v4389_v58 = vld [vmem:[#allocation10 + $0x84] sm:$0xf]  ;;  %v5278_v10 = vperm.slane %v5206_v44, 6  ;;  %v4418_v11 = vld [vmem:[#allocation11 + $0x64] sm:$0xf0] }
  0xf0   : > { %1703 = vmatpush.bf16.msra.mxu2 %v3629_v36  ;;  %1665 = vmatpush.bf16.msra.mxu0 %v3625_v45  ;;  %v4382_v36 = vld [vmem:[#allocation10 + $0x44] sm:$0xf0]  ;;  %v787_v45 = vpop.f32.mrf.mxu0  ;;  %v4436_v19 = vld [vmem:[#allocation11 + $0xf4] sm:$0xf0] }
  0xf1   : > { %1722 = vmatpush.bf16.msra.mxu3 %v3693_v46  ;;  %1684 = vmatpush.bf16.msra.mxu1 %v3689_v50  ;;  %v806_v46 = vpop.f32.mrf.mxu1  ;;  %v3785_v47 = vor.u32 %v4382_v36, %v3784_v34  ;;  %v4398_v50 = vld [vmem:[#allocation10 + $0xc4] sm:$0xf0]  ;;  %v3752_v34 = vld [vmem:[#allocation10] sm:$0xf]  ;;  %v4416_v24 = vld [vmem:[#allocation11 + $0x54] sm:$0xf0] }
  0xf2   : > { %1418 = vmatmul.bf16.vlgmr.msrb.gmra.mxu2 %v1170_v41  ;;  %1380 = vmatmul.bf16.vlgmr.msrb.gmra.mxu0 %v1170_v41  ;;  %v5257_v41 = vperm.slane %v5206_v44, 4 }
  0xf3   : > { %1437 = vmatmul.bf16.vlgmr.msrb.gmra.mxu3 %v1171_v42  ;;  %1399 = vmatmul.bf16.vlgmr.msrb.gmra.mxu1 %v1171_v42  ;;  %v5260_v42 = vperm.slane %v5206_v44, 5 }
  0xf4   : > { %1982 = vmatpush.bf16.msrb.mxu2 %v3813_v54  ;;  %1944 = vmatpush.bf16.msrb.mxu0 %v3809_v60  ;;  %v5264_v52 = vadd.f32 %v5250_v62, %v5257_v41  ;;  %v3849_v54 = vor.u32 %v4398_v50, %v3848_v49  ;;  %v788_v56 = vadd.f32 %v787_v45, %v5257_v41  ;;  %v3776_v60 = vld [vmem:[#allocation10 + $0x30] sm:$0xf]  ;;  %v3842_v62 = vld [vmem:[#allocation10 + $0xb8] sm:$0xf0]  ;;  %v4390_v49 = vld [vmem:[#allocation10 + $0x84] sm:$0xf0] }
  0xf5   : > { %2001 = vmatpush.bf16.msrb.mxu3 %v3877_v1  ;;  %1963 = vmatpush.bf16.msrb.mxu1 %v3873_v2  ;;  %v5267_v53 = vadd.f32 %v804_v7, %v5260_v42  ;;  %v807_v57 = vadd.f32 %v806_v46, %v5260_v42  ;;  %v3777_v61 = vor.u32 %v4380_v43, %v3776_v60  ;;  %v3840_v1 = vld [vmem:[#allocation10 + $0xb0] sm:$0xf]  ;;  %v842_v60 = vpop.f32.mrf.mxu3 }
  0xf6   : > { %v3845_v2 = vor.u32 %v4395_v0, %v3842_v62  ;;  %v856_v6 = vmax.f32 %v5264_v52, 0.0  ;;  %v864_v12 = vmax.f32 %v788_v56, 0.0  ;;  %v3753_v46 = vor.u32 %v4374_v37, %v3752_v34  ;;  %v3936_v52 = vld [vmem:[#allocation11 + $0x70] sm:$0xf]  ;;  %v3912_v34 = vld [vmem:[#allocation11 + $0x40] sm:$0xf] }
  0xf7   : > { %v857_v7 = vmax.f32 %v5267_v53, 0.0  ;;  %v865_v13 = vmax.f32 %v807_v57, 0.0  ;;  %v4420_v53 = vld [vmem:[#allocation11 + $0x74] sm:$0xf0]  ;;  %v3938_v57 = vld [vmem:[#allocation11 + $0x78] sm:$0xf0] }
  0xf8   : > { %1983 = vmatpush.bf16.msrb.mxu2 %v3805_v8  ;;  %1945 = vmatpush.bf16.msrb.mxu0 %v3801_v14  ;;  %v3841_v8 = vor.u32 %v4396_v3, %v3840_v1  ;;  %v4393_v14 = vld [vmem:[#allocation10 + $0xa4] sm:$0xf]  ;;  %v3937_v56 = vor.u32 %v4420_v53, %v3936_v52 }
  0xf9   : > { %2002 = vmatpush.bf16.msrb.mxu3 %v3869_v16  ;;  %1964 = vmatpush.bf16.msrb.mxu1 %v3865_v20  ;;  %v3837_v16 = vor.u32 %v4393_v14, %v3834_v5  ;;  %v790_v20 = vpop.f32.mrf.mxu0  ;;  %v1457_v45 = vpack.c.bf16 %v865_v13, %v857_v7  ;;  %v3930_v14 = vld [vmem:[#allocation11 + $0x68] sm:$0xf0]  ;;  %v4435_v5 = vld [vmem:[#allocation11 + $0xf4] sm:$0xf] }
  0xfc   : > { %1984 = vmatpush.bf16.msrb.mxu2 %v3797_v21  ;;  %1946 = vmatpush.bf16.msrb.mxu0 %v3793_v26  ;;  %v3833_v21 = vor.u32 %v4394_v18, %v3832_v17  ;;  %v809_v26 = vpop.f32.mrf.mxu1  ;;  %v4000_v18 = vld [vmem:[#allocation11 + $0xf0] sm:$0xf] }
  0xfd   : > { %2003 = vmatpush.bf16.msrb.mxu3 %v3861_v30  ;;  %1965 = vmatpush.bf16.msrb.mxu1 %v3857_v31  ;;  %v4373_v30 = vld [vmem:[#allocation10 + $0x4] sm:$0xf]  ;;  %v3754_v31 = vld [vmem:[#allocation10 + $0x8] sm:$0xf0]  ;;  %v810_v62 = vadd.f32 %v809_v26, %v5260_v42  ;;  %v4001_v23 = vor.u32 %v4436_v19, %v4000_v18  ;;  %v4415_v26 = vld [vmem:[#allocation11 + $0x54] sm:$0xf] }
  0xfe   : > { %v3757_v36 = vor.u32 %v4373_v30, %v3754_v31  ;;  %v3994_v30 = vld [vmem:[#allocation11 + $0xe8] sm:$0xf0]  ;;  %v3992_v31 = vld [vmem:[#allocation11 + $0xe0] sm:$0xf]  ;;  %v3968_v18 = vld [vmem:[#allocation11 + $0xb0] sm:$0xf] }
  0xff   : > { %v873_v38 = vmax.f32 %v810_v62, 0.0  ;;  %v3906_v62 = vld [vmem:[#allocation11 + $0x38] sm:$0xf0] }
 0x100   : > { %1985 = vmatpush.bf16.msrb.mxu2 %v3789_v35  ;;  %1947 = vmatpush.bf16.msrb.mxu0 %v3785_v47  ;;  %v3825_v35 = vor.u32 %v4392_v25, %v3824_v29  ;;  %v4433_v25 = vld [vmem:[#allocation11 + $0xe4] sm:$0xf] }
 0x101   : > { %2004 = vmatpush.bf16.msrb.mxu3 %v3853_v48  ;;  %1966 = vmatpush.bf16.msrb.mxu1 %v3849_v54  ;;  %v3816_v48 = vld [vmem:[#allocation10 + $0x80] sm:$0xf]  ;;  %v792_v51 = vpop.f32.mrf.mxu0  ;;  %v4419_v54 = vld [vmem:[#allocation11 + $0x74] sm:$0xf] }
 0x102   : > { %1423 = vmatmul.bf16.gmra.mxu2 %v1172_v40  ;;  %1385 = vmatmul.bf16.gmra.mxu0 %v1172_v40  ;;  %v3818_v40 = vld [vmem:[#allocation10 + $0x88] sm:$0xf0]  ;;  %v3817_v50 = vor.u32 %v4390_v49, %v3816_v48  ;;  %v3941_v43 = vor.u32 %v4419_v54, %v3938_v57  ;;  %v793_v0 = vadd.f32 %v792_v51, %v5257_v41  ;;  %v3986_v49 = vld [vmem:[#allocation11 + $0xd8] sm:$0xf0]  ;;  %v3984_v54 = vld [vmem:[#allocation11 + $0xd0] sm:$0xf] }
 0x103   : > { %1442 = vmatmul.bf16.gmra.mxu3 %v1173_v63  ;;  %1404 = vmatmul.bf16.gmra.mxu1 %v1173_v63  ;;  %v1456_v63 = vpack.c.bf16 %v864_v12, %v856_v6  ;;  %v3821_v47 = vor.u32 %v4389_v58, %v3818_v40  ;;  %v4417_v12 = vld [vmem:[#allocation11 + $0x64] sm:$0xf] }
 0x104   : > { %1986 = vmatpush.bf16.msrb.mxu2 %v3781_v59  ;;  %1948 = vmatpush.bf16.msrb.mxu0 %v3777_v61  ;;  %v811_v55 = vpop.f32.mrf.mxu1  ;;  %v823_v59 = vpop.f32.mrf.mxu2  ;;  %v791_v61 = vadd.f32 %v790_v20, %v5257_v41  ;;  %v880_v3 = vmax.f32 %v793_v0, 0.0  ;;  %v5281_v41 = vperm.slane %v5206_v44, 7  ;;  %v3920_v20 = vld [vmem:[#allocation11 + $0x50] sm:$0xf]  ;;  %v4413_v40 = vld [vmem:[#allocation11 + $0x44] sm:$0xf] }
 0x105   : > { %2005 = vmatpush.bf16.msrb.mxu3 %v3845_v2  ;;  %1967 = vmatpush.bf16.msrb.mxu1 %v3841_v8  ;;  %v812_v1 = vadd.f32 %v811_v55, %v5260_v42  ;;  %v3928_v42 = vld [vmem:[#allocation11 + $0x60] sm:$0xf]  ;;  %v3921_v39 = vor.u32 %v4416_v24, %v3920_v20  ;;  %v4432_v55 = vld [vmem:[#allocation11 + $0xd4] sm:$0xf0]  ;;  %v3888_v24 = vld [vmem:[#allocation11 + $0x10] sm:$0xf] }
 0x106   : > { %v872_v2 = vmax.f32 %v791_v61, 0.0  ;;  %v3929_v13 = vor.u32 %v4418_v11, %v3928_v42  ;;  %v843_v22 = vadd.f32 %v842_v60, %v5281_v41  ;;  %v3985_v57 = vor.u32 %v4432_v55, %v3984_v54  ;;  %v3904_v60 = vld [vmem:[#allocation11 + $0x30] sm:$0xf]  ;;  %v4411_v61 = vld [vmem:[#allocation11 + $0x34] sm:$0xf] }
 0x107   : > { %v881_v4 = vmax.f32 %v812_v1, 0.0  ;;  %v3909_v1 = vor.u32 %v4411_v61, %v3906_v62  ;;  %v3896_v42 = vld [vmem:[#allocation11 + $0x20] sm:$0xf]  ;;  %v4410_v11 = vld [vmem:[#allocation11 + $0x24] sm:$0xf0]  ;;  %v4460_v61 = vld [vmem:[#allocation13 + $0xb8] sm:$0xff] }
 0x108   : > { %1987 = vmatpush.bf16.msrb.mxu2 %v3773_v9  ;;  %1949 = vmatpush.bf16.msrb.mxu0 %v3769_v15  ;;  %v1458_v6 = vpack.c.bf16 %v880_v3, %v872_v2  ;;  %v844_v9 = vpop.f32.mrf.mxu3  ;;  %v4002_v15 = vld [vmem:[#allocation11 + $0xf8] sm:$0xf0]  ;;  %v4429_v2 = vld [vmem:[#allocation11 + $0xc4] sm:$0xf]  ;;  %v3978_v3 = vld [vmem:[#allocation11 + $0xc8] sm:$0xf0] }
 0x109   : > { %2006 = vmatpush.bf16.msrb.mxu3 %v3837_v16  ;;  %1968 = vmatpush.bf16.msrb.mxu1 %v3833_v21  ;;  %v1459_v7 = vpack.c.bf16 %v881_v4, %v873_v38  ;;  %v3933_v16 = vor.u32 %v4417_v12, %v3930_v14  ;;  %v4005_v17 = vor.u32 %v4435_v5, %v4002_v15  ;;  %v3976_v38 = vld [vmem:[#allocation11 + $0xc0] sm:$0xf]  ;;  %v4409_v12 = vld [vmem:[#allocation11 + $0x24] sm:$0xf]  ;;  %v3898_v5 = vld [vmem:[#allocation11 + $0x28] sm:$0xf0] }
 0x10a   : > { %v824_v21 = vadd.f32 %v823_v59, %v5278_v10  ;;  %v845_v28 = vadd.f32 %v844_v9, %v5281_v41  ;;  %v3981_v4 = vor.u32 %v4429_v2, %v3978_v3  ;;  %v3897_v14 = vor.u32 %v4410_v11, %v3896_v42  ;;  %v4421_v55 = vld [vmem:[#allocation11 + $0x84] sm:$0xf]  ;;  %v920_v62 = vld [vmem:[%s5416_s4] sm:$0x3]  ;;  %v4467_v2 = vld [vmem:[#allocation13 + $0xf0] sm:$0xff] }
 0x10b   : > { %v3901_v15 = vor.u32 %v4409_v12, %v3898_v5  ;;  %v923_v42 = vperm.slane %v920_v62, 1  ;;  %v4457_v12 = vld [vmem:[#allocation13 + $0xa0] sm:$0xff] }
 0x10c   : > { %1988 = vmatpush.bf16.msrb.mxu2 %v3765_v27  ;;  %1950 = vmatpush.bf16.msrb.mxu0 %v3761_v32  ;;  %v825_v8 = vpop.f32.mrf.mxu2  ;;  %v3922_v27 = vld [vmem:[#allocation11 + $0x58] sm:$0xf0]  ;;  %v3997_v32 = vor.u32 %v4433_v25, %v3994_v30  ;;  %v867_v51 = vmax.f32 %v845_v28, 0.0  ;;  %v4425_v30 = vld [vmem:[#allocation11 + $0xa4] sm:$0xf] }
 0x10d   : > { %2007 = vmatpush.bf16.msrb.mxu3 %v3829_v33  ;;  %1969 = vmatpush.bf16.msrb.mxu1 %v3825_v35  ;;  %v826_v44 = vadd.f32 %v825_v8, %v5278_v10  ;;  %v3925_v29 = vor.u32 %v4415_v26, %v3922_v27  ;;  %v4434_v33 = vld [vmem:[#allocation11 + $0xe4] sm:$0xf0]  ;;  %v4408_v26 = vld [vmem:[#allocation11 + $0x14] sm:$0xf0]  ;;  %v4407_v27 = vld [vmem:[#allocation11 + $0x14] sm:$0xf] }
 0x10e   : > { %v4414_v35 = vld [vmem:[#allocation11 + $0x44] sm:$0xf0]  ;;  %v3993_v58 = vor.u32 %v4434_v33, %v3992_v31  ;;  %v3962_v31 = vld [vmem:[#allocation11 + $0xa8] sm:$0xf0] }
 0x10f   : > { %v3913_v48 = vor.u32 %v4414_v35, %v3912_v34  ;;  %v3965_v34 = vor.u32 %v4425_v30, %v3962_v31  ;;  %v4426_v35 = vld [vmem:[#allocation11 + $0xa4] sm:$0xf0] }
 0x110   : > { %1989 = vmatpush.bf16.msrb.mxu2 %v3757_v36  ;;  %1951 = vmatpush.bf16.msrb.mxu0 %v3753_v46  ;;  %v847_v37 = vpop.f32.mrf.mxu3  ;;  %v858_v46 = vmax.f32 %v824_v21, 0.0 }
 0x111   : > { %2008 = vmatpush.bf16.msrb.mxu3 %v3821_v47  ;;  %1970 = vmatpush.bf16.msrb.mxu1 %v3817_v50  ;;  %v866_v47 = vmax.f32 %v826_v44, 0.0  ;;  %v859_v50 = vmax.f32 %v843_v22, 0.0  ;;  %v848_v19 = vadd.f32 %v847_v37, %v5281_v41  ;;  %v4428_v44 = vld [vmem:[#allocation11 + $0xb4] sm:$0xf0]  ;;  %v3880_v37 = vld [vmem:[#allocation11] sm:$0xf] }
 0x112   : > { %1704 = vmatmul.bf16.vlgmr.msra.gmra.mxu2 %v1456_v63  ;;  %1666 = vmatmul.bf16.vlgmr.msra.gmra.mxu0 %v1456_v63  ;;  %v3914_v63 = vld [vmem:[#allocation11 + $0x48] sm:$0xf0] }
 0x113   : > { %1723 = vmatmul.bf16.vlgmr.msra.gmra.mxu3 %v1457_v45  ;;  %1685 = vmatmul.bf16.vlgmr.msra.gmra.mxu1 %v1457_v45  ;;  %v4431_v45 = vld [vmem:[#allocation11 + $0xd4] sm:$0xf]  ;;  %v3917_v52 = vor.u32 %v4413_v40, %v3914_v63  ;;  %v1743_v59 = vpack.c.bf16 %v867_v51, %v859_v50  ;;  %v4405_v40 = vld [vmem:[#allocation11 + $0x4] sm:$0xf] }
 0x114   : > { %2230 = vmatpush.bf16.msra.mxu0 %v3937_v56  ;;  %2268 = vmatpush.bf16.msra.mxu2 %v3941_v43  ;;  %v828_v36 = vpop.f32.mrf.mxu2  ;;  %v3989_v53 = vor.u32 %v4431_v45, %v3986_v49  ;;  %v1742_v56 = vpack.c.bf16 %v866_v47, %v858_v46  ;;  %v4412_v43 = vld [vmem:[#allocation11 + $0x34] sm:$0xf0]  ;;  %v3882_v45 = vld [vmem:[#allocation11 + $0x8] sm:$0xf0]  ;;  %v4423_v47 = vld [vmem:[#allocation11 + $0x94] sm:$0xf] }
 0x115   : > { %2287 = vmatpush.bf16.msra.mxu3 %v4005_v17  ;;  %2249 = vmatpush.bf16.msra.mxu1 %v4001_v23  ;;  %v3905_v0 = vor.u32 %v4412_v43, %v3904_v60  ;;  %v3970_v17 = vld [vmem:[#allocation11 + $0xb8] sm:$0xf0]  ;;  %v3969_v23 = vor.u32 %v4428_v44, %v3968_v18  ;;  %v3885_v46 = vor.u32 %v4405_v40, %v3882_v45  ;;  %v3952_v49 = vld [vmem:[#allocation11 + $0x90] sm:$0xf]  ;;  %v4422_v60 = vld [vmem:[#allocation11 + $0x84] sm:$0xf0] }
 0x118   : > { %2231 = vmatpush.bf16.msra.mxu0 %v3929_v13  ;;  %2269 = vmatpush.bf16.msra.mxu2 %v3933_v16  ;;  %v849_v8 = vpop.f32.mrf.mxu3  ;;  %v829_v13 = vadd.f32 %v828_v36, %v5278_v10  ;;  %v4427_v16 = vld [vmem:[#allocation11 + $0xb4] sm:$0xf] }
 0x119   : > { %2288 = vmatpush.bf16.msra.mxu3 %v3997_v32  ;;  %2250 = vmatpush.bf16.msra.mxu1 %v3993_v58  ;;  %v850_v21 = vadd.f32 %v849_v8, %v5281_v41  ;;  %v3973_v22 = vor.u32 %v4427_v16, %v3970_v17  ;;  %v3960_v32 = vld [vmem:[#allocation11 + $0xa0] sm:$0xf]  ;;  %v4406_v58 = vld [vmem:[#allocation11 + $0x4] sm:$0xf0] }
 0x11a   : > { %v874_v28 = vmax.f32 %v829_v13, 0.0  ;;  %v3961_v36 = vor.u32 %v4426_v35, %v3960_v32  ;;  %v3881_v63 = vor.u32 %v4406_v58, %v3880_v37  ;;  %v4465_v13 = vld [vmem:[#allocation13 + $0xe0] sm:$0xff] }
 0x11b   : > { %v883_v41 = vmax.f32 %v850_v21, 0.0  ;;  %v4453_v37 = vld [vmem:[#allocation13 + $0x80] sm:$0xff] }
 0x11c   : > { %2232 = vmatpush.bf16.msra.mxu0 %v3921_v39  ;;  %2270 = vmatpush.bf16.msra.mxu2 %v3925_v29  ;;  %v3889_v39 = vor.u32 %v4408_v26, %v3888_v24  ;;  %v3890_v29 = vld [vmem:[#allocation11 + $0x18] sm:$0xf0]  ;;  %v4461_v58 = vld [vmem:[#allocation13 + $0xc0] sm:$0xff] }
 0x11d   : > { %2289 = vmatpush.bf16.msra.mxu3 %v3989_v53  ;;  %2251 = vmatpush.bf16.msra.mxu1 %v3985_v57  ;;  %v3893_v25 = vor.u32 %v4407_v27, %v3890_v29  ;;  %v3944_v57 = vld [vmem:[#allocation11 + $0x80] sm:$0xf] }
 0x11e   : > { %v3945_v43 = vor.u32 %v4422_v60, %v3944_v57 }
 0x120   : > { %2233 = vmatpush.bf16.msra.mxu0 %v3913_v48  ;;  %2271 = vmatpush.bf16.msra.mxu2 %v3917_v52  ;;  %v3954_v48 = vld [vmem:[#allocation11 + $0x98] sm:$0xf0]  ;;  %v4424_v52 = vld [vmem:[#allocation11 + $0x94] sm:$0xf0] }
 0x121   : > { %2290 = vmatpush.bf16.msra.mxu3 %v3981_v4  ;;  %v3957_v51 = vor.u32 %v4423_v47, %v3954_v48  ;;  %v3953_v54 = vor.u32 %v4424_v52, %v3952_v49 }
 0x122   : > { %1709 = vmatmul.bf16.gmra.mxu2 %v1458_v6  ;;  %1671 = vmatmul.bf16.gmra.mxu0 %v1458_v6  ;;  %v4430_v6 = vld [vmem:[#allocation11 + $0xc4] sm:$0xf0] }
 0x123   : > { %1728 = vmatmul.bf16.gmra.mxu3 %v1459_v7  ;;  %1690 = vmatmul.bf16.gmra.mxu1 %v1459_v7  ;;  %v830_v7 = vpop.f32.mrf.mxu2  ;;  %v3977_v9 = vor.u32 %v4430_v6, %v3976_v38  ;;  %v922_v38 = vperm.slane %v920_v62, 0  ;;  %v4458_v6 = vld [vmem:[#allocation13 + $0xa8] sm:$0xff] }
 0x124   : > { %2234 = vmatpush.bf16.msra.mxu0 %v3905_v0  ;;  %2272 = vmatpush.bf16.msra.mxu2 %v3909_v1  ;;  %v831_v20 = vadd.f32 %v830_v7, %v5278_v10  ;;  %v875_v10 = vmax.f32 %v848_v19, 0.0  ;;  %v4468_v0 = vld [vmem:[#allocation13 + $0xf8] sm:$0xff]  ;;  %v4459_v1 = vld [vmem:[#allocation13 + $0xb0] sm:$0xff]  ;;  %v4466_v7 = vld [vmem:[#allocation13 + $0xe8] sm:$0xff] }
 0x125   : > { %2252 = vmatpush.bf16.msra.mxu1 %v3977_v9  ;;  %2291 = vmatpush.bf16.msra.mxu3 %v3973_v22  ;;  %v4456_v19 = vld [vmem:[#allocation13 + $0x98] sm:$0xff] }
 0x126   : > { %v882_v33 = vmax.f32 %v831_v20, 0.0  ;;  %v1745_v53 = vpack.c.bf16 %v883_v41, %v875_v10  ;;  %v4464_v20 = vld [vmem:[#allocation13 + $0xd8] sm:$0xff]  ;;  %v4454_v10 = vld [vmem:[#allocation13 + $0x88] sm:$0xff] }
 0x128   : > { %2235 = vmatpush.bf16.msra.mxu0 %v3897_v14  ;;  %2273 = vmatpush.bf16.msra.mxu2 %v3901_v15  ;;  %v1744_v50 = vpack.c.bf16 %v882_v33, %v874_v28  ;;  %v4455_v28 = vld [vmem:[#allocation13 + $0x90] sm:$0xff]  ;;  %v4462_v33 = vld [vmem:[#allocation13 + $0xc8] sm:$0xff] }
 0x129   : > { %2253 = vmatpush.bf16.msra.mxu1 %v3969_v23  ;;  %2292 = vmatpush.bf16.msra.mxu3 %v3965_v34 }
 0x12c   : > { %2236 = vmatpush.bf16.msra.mxu0 %v3889_v39  ;;  %2274 = vmatpush.bf16.msra.mxu2 %v3893_v25  ;;  %v4463_v39 = vld [vmem:[#allocation13 + $0xd0] sm:$0xff] }
 0x12d   : > { %2254 = vmatpush.bf16.msra.mxu1 %v3961_v36  ;;  %2293 = vmatpush.bf16.msra.mxu3 %v3957_v51 }
 0x130   : > { %2237 = vmatpush.bf16.msra.mxu0 %v3881_v63  ;;  %2275 = vmatpush.bf16.msra.mxu2 %v3885_v46 }
 0x131   : > { %2255 = vmatpush.bf16.msra.mxu1 %v3953_v54 }
 0x132   : > { %1990 = vmatmul.bf16.vlgmr.msrb.gmra.mxu2 %v1742_v56  ;;  %1952 = vmatmul.bf16.vlgmr.msrb.gmra.mxu0 %v1742_v56  ;;  %v3946_v56 = vld [vmem:[#allocation11 + $0x88] sm:$0xf0] }
 0x133   : > { %2009 = vmatmul.bf16.vlgmr.msrb.gmra.mxu3 %v1743_v59  ;;  %1971 = vmatmul.bf16.vlgmr.msrb.gmra.mxu1 %v1743_v59  ;;  %v3949_v59 = vor.u32 %v4421_v55, %v3946_v56  ;;  %v1206_v56 = vld [vmem:[%s5418_s6] sm:$0x3] }
 0x134   : > { %2964 = vmatpush.bf16.msrb.mxu2 %v4460_v61  ;;  %v1209_v62 = vperm.slane %v1206_v56, 1 }
 0x135   : > { %2294 = vmatpush.bf16.msra.mxu3 %v3949_v59  ;;  %2256 = vmatpush.bf16.msra.mxu1 %v3945_v43  ;;  %v1208_v43 = vperm.slane %v1206_v56, 0 }
 0x138   : > { %2965 = vmatpush.bf16.msrb.mxu2 %v4459_v1 }
 0x139   : > { %2983 = vmatpush.bf16.msrb.mxu3 %v4468_v0 }
 0x13c   : > { %2966 = vmatpush.bf16.msrb.mxu2 %v4458_v6 }
 0x13d   : > { %2984 = vmatpush.bf16.msrb.mxu3 %v4467_v2 }
 0x140   : > { %2967 = vmatpush.bf16.msrb.mxu2 %v4457_v12 }
 0x141   : > { %2985 = vmatpush.bf16.msrb.mxu3 %v4466_v7 }
 0x142   : > { %1995 = vmatmul.bf16.gmra.mxu2 %v1744_v50  ;;  %1957 = vmatmul.bf16.gmra.mxu0 %v1744_v50 }
 0x143   : > { %2014 = vmatmul.bf16.gmra.mxu3 %v1745_v53  ;;  %1976 = vmatmul.bf16.gmra.mxu1 %v1745_v53 }
 0x144   : > { %2968 = vmatpush.bf16.msrb.mxu2 %v4456_v19 }
 0x145   : > { %2986 = vmatpush.bf16.msrb.mxu3 %v4465_v13 }
 0x148   : > { %2969 = vmatpush.bf16.msrb.mxu2 %v4455_v28 }
 0x149   : > { %2987 = vmatpush.bf16.msrb.mxu3 %v4464_v20 }
 0x14c   : > { %2970 = vmatpush.bf16.msrb.mxu2 %v4454_v10 }
 0x14d   : > { %2988 = vmatpush.bf16.msrb.mxu3 %v4463_v39 }
 0x14f   : > { %v1095_v3 = vpop.f32.mrf.mxu0 }
 0x150   : > { %v1114_v4 = vpop.f32.mrf.mxu1  ;;  %v1096_v8 = vadd.f32 %v1095_v3, %v922_v38  ;;  %2971 = vmatpush.bf16.msrb.mxu2 %v4453_v37 }
 0x151   : > { %2989 = vmatpush.bf16.msrb.mxu3 %v4462_v33 }
 0x152   : > { %v1115_v5 = vadd.f32 %v1114_v4, %v1096_v8 }
 0x154   : > { %v1162_v21 = vmax.f32 %v1115_v5, 0.0 }
 0x155   : > { %v1133_v9 = vpop.f32.mrf.mxu2  ;;  %2990 = vmatpush.bf16.msrb.mxu3 %v4461_v58 }
 0x156   : > { %v1152_v11 = vpop.f32.mrf.mxu3  ;;  %v1134_v17 = vadd.f32 %v1133_v9, %v923_v42 }
 0x157   : > { %v1097_v14 = vpop.f32.mrf.mxu0 }
 0x158   : > { %v1098_v15 = vadd.f32 %v1097_v14, %v922_v38  ;;  %v1116_v16 = vpop.f32.mrf.mxu1  ;;  %v1153_v23 = vadd.f32 %v1152_v11, %v1134_v17 }
 0x15a   : > { %v1117_v18 = vadd.f32 %v1116_v16, %v1098_v15  ;;  %v1163_v31 = vmax.f32 %v1153_v23, 0.0 }
 0x15c   : > { %v1164_v22 = vmax.f32 %v1117_v18, 0.0 }
 0x15d   : > { %v1135_v44 = vpop.f32.mrf.mxu2 }
 0x15e   : > { %v2028_v24 = vpack.c.bf16 %v1164_v22, %v1162_v21  ;;  %v1136_v26 = vadd.f32 %v1135_v44, %v923_v42  ;;  %v1154_v27 = vpop.f32.mrf.mxu3 }
 0x15f   : > { %v1100_v29 = vpop.f32.mrf.mxu0 }
 0x160   : > { %v1155_v25 = vadd.f32 %v1154_v27, %v1136_v26  ;;  %v1119_v30 = vpop.f32.mrf.mxu1  ;;  %2238 = vmatmul.bf16.vlgmr.msra.gmra.mxu0 %v2028_v24  ;;  %2276 = vmatmul.bf16.vlgmr.msra.gmra.mxu2 %v2028_v24  ;;  %v1101_v34 = vadd.f32 %v1100_v29, %v922_v38 }
 0x162   : > { %v1165_v32 = vmax.f32 %v1155_v25, 0.0  ;;  %v1120_v63 = vadd.f32 %v1119_v30, %v1101_v34 }
 0x164   : > { %v2029_v41 = vpack.c.bf16 %v1165_v32, %v1163_v31  ;;  %v1166_v49 = vmax.f32 %v1120_v63, 0.0 }
 0x165   : > { %v1138_v35 = vpop.f32.mrf.mxu2 }
 0x166   : > { %v1157_v36 = vpop.f32.mrf.mxu3  ;;  %2257 = vmatmul.bf16.vlgmr.msra.gmra.mxu1 %v2029_v41  ;;  %2295 = vmatmul.bf16.vlgmr.msra.gmra.mxu3 %v2029_v41  ;;  %v1139_v47 = vadd.f32 %v1138_v35, %v923_v42  ;;  %v1492_v41 = vld [vmem:[%s5420_s8] sm:$0x3]  ;;  %v4492_v35 = vld [vmem:[#allocation13 + $0x1b8] sm:$0xff] }
 0x167   : > { %v1102_v40 = vpop.f32.mrf.mxu0  ;;  %v5300_v37 = vperm.slane %v1492_v41, 0  ;;  %3040 = vmatpush.bf16.msra.mxu2 %v4492_v35 }
 0x168   : > { %v1103_v45 = vadd.f32 %v1102_v40, %v922_v38  ;;  %v1121_v46 = vpop.f32.mrf.mxu1  ;;  %v1158_v52 = vadd.f32 %v1157_v36, %v1139_v47  ;;  %v4500_v36 = vld [vmem:[#allocation13 + $0x1f8] sm:$0xff] }
 0x169   : > { %3059 = vmatpush.bf16.msra.mxu3 %v4500_v36 }
 0x16a   : > { %v1122_v48 = vadd.f32 %v1121_v46, %v1103_v45  ;;  %v1167_v61 = vmax.f32 %v1158_v52, 0.0 }
 0x16c   : > { %v1168_v50 = vmax.f32 %v1122_v48, 0.0  ;;  %v4491_v48 = vld [vmem:[#allocation13 + $0x1b0] sm:$0xff] }
 0x16d   : > { %v1140_v51 = vpop.f32.mrf.mxu2  ;;  %3041 = vmatpush.bf16.msra.mxu2 %v4491_v48 }
 0x16e   : > { %v1141_v53 = vadd.f32 %v1140_v51, %v923_v42  ;;  %v1159_v54 = vpop.f32.mrf.mxu3  ;;  %v2030_v55 = vpack.c.bf16 %v1168_v50, %v1166_v49  ;;  %v4499_v49 = vld [vmem:[#allocation13 + $0x1f0] sm:$0xff] }
 0x16f   : > { %v1381_v57 = vpop.f32.mrf.mxu0  ;;  %3060 = vmatpush.bf16.msra.mxu3 %v4499_v49 }
 0x170   : > { %v1160_v59 = vadd.f32 %v1159_v54, %v1141_v53  ;;  %2243 = vmatmul.bf16.gmra.mxu0 %v2030_v55  ;;  %2281 = vmatmul.bf16.gmra.mxu2 %v2030_v55  ;;  %v1400_v60 = vpop.f32.mrf.mxu1  ;;  %v1382_v2 = vadd.f32 %v1381_v57, %v1208_v43 }
 0x172   : > { %v1169_v0 = vmax.f32 %v1160_v59, 0.0  ;;  %v1401_v8 = vadd.f32 %v1400_v60, %v1382_v2  ;;  %v5303_v59 = vperm.slane %v1492_v41, 1  ;;  %v4490_v60 = vld [vmem:[#allocation13 + $0x1a8] sm:$0xff] }
 0x173   : > { %3042 = vmatpush.bf16.msra.mxu2 %v4490_v60 }
 0x174   : > { %v2031_v1 = vpack.c.bf16 %v1169_v0, %v1167_v61  ;;  %v1448_v11 = vmax.f32 %v1401_v8, 0.0 }
 0x175   : > { %v1419_v3 = vpop.f32.mrf.mxu2 }
 0x176   : > { %v1420_v38 = vadd.f32 %v1419_v3, %v1209_v62  ;;  %2262 = vmatmul.bf16.gmra.mxu1 %v2031_v1  ;;  %2300 = vmatmul.bf16.gmra.mxu3 %v2031_v1  ;;  %v1438_v4 = vpop.f32.mrf.mxu3 }
 0x177   : > { %v1383_v6 = vpop.f32.mrf.mxu0 }
 0x178   : > { %v1402_v7 = vpop.f32.mrf.mxu1  ;;  %v1439_v9 = vadd.f32 %v1438_v4, %v1420_v38  ;;  %v1384_v42 = vadd.f32 %v1383_v6, %v1208_v43  ;;  %v4489_v6 = vld [vmem:[#allocation13 + $0x1a0] sm:$0xff] }
 0x179   : > { %3043 = vmatpush.bf16.msra.mxu2 %v4489_v6 }
 0x17a   : > { %v1449_v12 = vmax.f32 %v1439_v9, 0.0  ;;  %v1403_v14 = vadd.f32 %v1402_v7, %v1384_v42  ;;  %v4497_v7 = vld [vmem:[#allocation13 + $0x1e0] sm:$0xff] }
 0x17c   : > { %v2318_v19 = vpack.c.bf16 %v1449_v12, %v1448_v11  ;;  %v1450_v20 = vmax.f32 %v1403_v14, 0.0 }
 0x17d   : > { %v1421_v13 = vpop.f32.mrf.mxu2 }
 0x17e   : > { %v1422_v5 = vadd.f32 %v1421_v13, %v1209_v62  ;;  %v1440_v15 = vpop.f32.mrf.mxu3  ;;  %v2354_v44 = vunpack.c.l.b16 %v2318_v19  ;;  %v2355_v26 = vunpack.c.h.b16 %v2318_v19 }
 0x17f   : > { %v1386_v16 = vpop.f32.mrf.mxu0 }
 0x180   : > { %v1441_v17 = vadd.f32 %v1440_v15, %v1422_v5  ;;  %v1405_v18 = vpop.f32.mrf.mxu1  ;;  %v1387_v23 = vadd.f32 %v1386_v16, %v1208_v43  ;;  %v4488_v16 = vld [vmem:[#allocation13 + $0x198] sm:$0xff] }
 0x181   : > { %3044 = vmatpush.bf16.msra.mxu2 %v4488_v16  ;;  %v4444_v16 = vld [vmem:[#allocation13 + $0x38] sm:$0xff] }
 0x182   : > { %v1451_v21 = vmax.f32 %v1441_v17, 0.0  ;;  %v1406_v10 = vadd.f32 %v1405_v18, %v1387_v23  ;;  %v4496_v17 = vld [vmem:[#allocation13 + $0x1d8] sm:$0xff]  ;;  %2926 = vmatpush.bf16.msrb.mxu0 %v4444_v16  ;;  %v4445_v16 = vld [vmem:[#allocation13 + $0x40] sm:$0xff] }
 0x184   : > { %v2319_v22 = vpack.c.bf16 %v1451_v21, %v1450_v20  ;;  %v1452_v58 = vmax.f32 %v1406_v10, 0.0 }
 0x185   : > { %v1424_v24 = vpop.f32.mrf.mxu2 }
 0x186   : > { %v2356_v27 = vunpack.c.l.b16 %v2319_v22  ;;  %v2357_v28 = vunpack.c.h.b16 %v2319_v22  ;;  %v1425_v39 = vadd.f32 %v1424_v24, %v1209_v62  ;;  %v1443_v29 = vpop.f32.mrf.mxu3  ;;  %v4487_v22 = vld [vmem:[#allocation13 + $0x190] sm:$0xff] }
 0x187   : > { %v1388_v25 = vpop.f32.mrf.mxu0  ;;  %3045 = vmatpush.bf16.msra.mxu2 %v4487_v22 }
 0x188   : > { %v2362_v30 = vpack.c.b16 %v2356_v27, %v2354_v44  ;;  %v2363_v31 = vpack.c.b16 %v2357_v28, %v2355_v26  ;;  %v1407_v32 = vpop.f32.mrf.mxu1  ;;  %v1444_v33 = vadd.f32 %v1443_v29, %v1425_v39  ;;  %v1389_v34 = vadd.f32 %v1388_v25, %v1208_v43  ;;  %v4498_v43 = vld [vmem:[#allocation13 + $0x1e8] sm:$0xff]  ;;  %v4495_v44 = vld [vmem:[#allocation13 + $0x1d0] sm:$0xff] }
 0x189   : > { %3061 = vmatpush.bf16.msra.mxu3 %v4498_v43  ;;  %v4486_v25 = vld [vmem:[#allocation13 + $0x188] sm:$0xff] }
 0x18a   : > { %2972 = vmatmul.bf16.vlgmr.msrb.gmra.mxu2 %v2362_v30  ;;  %2991 = vmatmul.bf16.vlgmr.msrb.gmra.mxu3 %v2363_v31  ;;  %v1453_v40 = vmax.f32 %v1444_v33, 0.0  ;;  %v1408_v45 = vadd.f32 %v1407_v32, %v1389_v34  ;;  %v4494_v30 = vld [vmem:[#allocation13 + $0x1c8] sm:$0xff] }
 0x18b   : > { %3046 = vmatpush.bf16.msra.mxu2 %v4486_v25 }
 0x18c   : > { %v2320_v54 = vpack.c.bf16 %v1453_v40, %v1452_v58  ;;  %v1454_v55 = vmax.f32 %v1408_v45, 0.0  ;;  %v4485_v58 = vld [vmem:[#allocation13 + $0x180] sm:$0xff] }
 0x18d   : > { %v1426_v63 = vpop.f32.mrf.mxu2  ;;  %3062 = vmatpush.bf16.msra.mxu3 %v4497_v7  ;;  %v4493_v40 = vld [vmem:[#allocation13 + $0x1c0] sm:$0xff] }
 0x18e   : > { %v1427_v46 = vadd.f32 %v1426_v63, %v1209_v62  ;;  %v1445_v47 = vpop.f32.mrf.mxu3  ;;  %v2358_v0 = vunpack.c.l.b16 %v2320_v54  ;;  %v2359_v1 = vunpack.c.h.b16 %v2320_v54 }
 0x18f   : > { %v1667_v50 = vpop.f32.mrf.mxu0  ;;  %3047 = vmatpush.bf16.msra.mxu2 %v4485_v58 }
 0x190   : > { %v1446_v51 = vadd.f32 %v1445_v47, %v1427_v46  ;;  %v1668_v52 = vadd.f32 %v1667_v50, %v5300_v37  ;;  %v1686_v53 = vpop.f32.mrf.mxu1 }
 0x191   : > { %3063 = vmatpush.bf16.msra.mxu3 %v4496_v17  ;;  %v4452_v17 = vld [vmem:[#allocation13 + $0x78] sm:$0xff] }
 0x192   : > { %v1455_v56 = vmax.f32 %v1446_v51, 0.0  ;;  %v1687_v57 = vadd.f32 %v1686_v53, %v1668_v52  ;;  %2945 = vmatpush.bf16.msrb.mxu1 %v4452_v17  ;;  %v4476_v17 = vld [vmem:[#allocation13 + $0x138] sm:$0xff] }
 0x194   : > { %v2321_v61 = vpack.c.bf16 %v1455_v56, %v1454_v55  ;;  %v1734_v8 = vmax.f32 %v1687_v57, 0.0  ;;  %v1778_v57 = vld [vmem:[%s5422_s10] sm:$0x3] }
 0x195   : > { %v1705_v62 = vpop.f32.mrf.mxu2  ;;  %3064 = vmatpush.bf16.msra.mxu3 %v4495_v44 }
 0x196   : > { %v2360_v2 = vunpack.c.l.b16 %v2321_v61  ;;  %v2361_v3 = vunpack.c.h.b16 %v2321_v61  ;;  %v1706_v38 = vadd.f32 %v1705_v62, %v5303_v59  ;;  %v1724_v4 = vpop.f32.mrf.mxu3 }
 0x197   : > { %v1669_v9 = vpop.f32.mrf.mxu0 }
 0x198   : > { %v1725_v42 = vadd.f32 %v1724_v4, %v1706_v38  ;;  %v1670_v11 = vadd.f32 %v1669_v9, %v5300_v37  ;;  %v2364_v12 = vpack.c.b16 %v2360_v2, %v2358_v0  ;;  %v2365_v13 = vpack.c.b16 %v2361_v3, %v2359_v1  ;;  %v1688_v14 = vpop.f32.mrf.mxu1 }
 0x199   : > { %3065 = vmatpush.bf16.msra.mxu3 %v4494_v30  ;;  %v1780_v0 = vperm.slane %v1778_v57, 0  ;;  %v5319_v1 = vperm.slane %v1778_v57, 1 }
 0x19a   : > { %v1735_v5 = vmax.f32 %v1725_v42, 0.0  ;;  %2977 = vmatmul.bf16.gmra.mxu2 %v2364_v12  ;;  %2996 = vmatmul.bf16.gmra.mxu3 %v2365_v13  ;;  %v1689_v15 = vadd.f32 %v1688_v14, %v1670_v11 }
 0x19c   : > { %v2322_v18 = vpack.c.bf16 %v1735_v5, %v1734_v8  ;;  %v1736_v28 = vmax.f32 %v1689_v15, 0.0 }
 0x19d   : > { %v1707_v19 = vpop.f32.mrf.mxu2  ;;  %3066 = vmatpush.bf16.msra.mxu3 %v4493_v40 }
 0x19e   : > { %v1708_v20 = vadd.f32 %v1707_v19, %v5303_v59  ;;  %v1726_v21 = vpop.f32.mrf.mxu3  ;;  %v2374_v32 = vunpack.c.l.b16 %v2322_v18  ;;  %v2375_v33 = vunpack.c.h.b16 %v2322_v18 }
 0x19f   : > { %v1672_v23 = vpop.f32.mrf.mxu0 }
 0x1a0   : > { %v1727_v24 = vadd.f32 %v1726_v21, %v1708_v20  ;;  %v1673_v26 = vadd.f32 %v1672_v23, %v5300_v37  ;;  %v1691_v27 = vpop.f32.mrf.mxu1  ;;  %v4443_v23 = vld [vmem:[#allocation13 + $0x30] sm:$0xff] }
 0x1a1   : > { %2927 = vmatpush.bf16.msrb.mxu0 %v4443_v23  ;;  %v4474_v23 = vld [vmem:[#allocation13 + $0x128] sm:$0xff] }
 0x1a2   : > { %v1737_v39 = vmax.f32 %v1727_v24, 0.0  ;;  %v1692_v29 = vadd.f32 %v1691_v27, %v1673_v26  ;;  %v4451_v24 = vld [vmem:[#allocation13 + $0x70] sm:$0xff] }
 0x1a3   : > { %2946 = vmatpush.bf16.msrb.mxu1 %v4451_v24  ;;  %v4482_v24 = vld [vmem:[#allocation13 + $0x168] sm:$0xff] }
 0x1a4   : > { %v2323_v31 = vpack.c.bf16 %v1737_v39, %v1736_v28  ;;  %v1738_v63 = vmax.f32 %v1692_v29, 0.0 }
 0x1a5   : > { %v1710_v10 = vpop.f32.mrf.mxu2 }
 0x1a6   : > { %v2376_v41 = vunpack.c.l.b16 %v2323_v31  ;;  %v2377_v34 = vunpack.c.h.b16 %v2323_v31  ;;  %v1711_v35 = vadd.f32 %v1710_v10, %v5303_v59  ;;  %v1729_v36 = vpop.f32.mrf.mxu3  ;;  %v4442_v31 = vld [vmem:[#allocation13 + $0x28] sm:$0xff] }
 0x1a7   : > { %v1674_v45 = vpop.f32.mrf.mxu0  ;;  %2928 = vmatpush.bf16.msrb.mxu0 %v4442_v31 }
 0x1a8   : > { %v5310_v46 = vpack.c.b16 %v2376_v41, %v2374_v32  ;;  %v5312_v47 = vpack.c.b16 %v2377_v34, %v2375_v33  ;;  %v1730_v48 = vadd.f32 %v1729_v36, %v1711_v35  ;;  %v1675_v49 = vadd.f32 %v1674_v45, %v5300_v37  ;;  %v1693_v50 = vpop.f32.mrf.mxu1  ;;  %v4450_v32 = vld [vmem:[#allocation13 + $0x68] sm:$0xff]  ;;  %v4441_v45 = vld [vmem:[#allocation13 + $0x20] sm:$0xff] }
 0x1a9   : > { %2947 = vmatpush.bf16.msrb.mxu1 %v4450_v32 }
 0x1aa   : > { %v1739_v51 = vmax.f32 %v1730_v48, 0.0  ;;  %v1694_v52 = vadd.f32 %v1693_v50, %v1675_v49  ;;  %v4449_v50 = vld [vmem:[#allocation13 + $0x60] sm:$0xff] }
 0x1ab   : > { %2929 = vmatpush.bf16.msrb.mxu0 %v4441_v45 }
 0x1ac   : > { %v2324_v53 = vpack.c.bf16 %v1739_v51, %v1738_v63  ;;  %v1740_v62 = vmax.f32 %v1694_v52, 0.0 }
 0x1ad   : > { %v1712_v54 = vpop.f32.mrf.mxu2  ;;  %2948 = vmatpush.bf16.msrb.mxu1 %v4449_v50 }
 0x1ae   : > { %v1713_v55 = vadd.f32 %v1712_v54, %v5303_v59  ;;  %v1731_v56 = vpop.f32.mrf.mxu3  ;;  %v2378_v3 = vunpack.c.l.b16 %v2324_v53  ;;  %v2379_v6 = vunpack.c.h.b16 %v2324_v53 }
 0x1af   : > { %v1953_v60 = vpop.f32.mrf.mxu0 }
 0x1b0   : > { %v1732_v43 = vadd.f32 %v1731_v56, %v1713_v55  ;;  %v1972_v61 = vpop.f32.mrf.mxu1  ;;  %v1954_v38 = vadd.f32 %v1953_v60, %v1780_v0  ;;  %v4440_v55 = vld [vmem:[#allocation13 + $0x18] sm:$0xff] }
 0x1b1   : > { %v4448_v56 = vld [vmem:[#allocation13 + $0x58] sm:$0xff]  ;;  %2930 = vmatpush.bf16.msrb.mxu0 %v4440_v55 }
 0x1b2   : > { %v1741_v37 = vmax.f32 %v1732_v43, 0.0  ;;  %v1973_v14 = vadd.f32 %v1972_v61, %v1954_v38  ;;  %2949 = vmatpush.bf16.msrb.mxu1 %v4448_v56  ;;  %v4447_v38 = vld [vmem:[#allocation13 + $0x50] sm:$0xff] }
 0x1b4   : > { %v2325_v2 = vpack.c.bf16 %v1741_v37, %v1740_v62  ;;  %v2020_v18 = vmax.f32 %v1973_v14, 0.0 }
 0x1b5   : > { %v1991_v4 = vpop.f32.mrf.mxu2 }
 0x1b6   : > { %v2380_v7 = vunpack.c.l.b16 %v2325_v2  ;;  %v2381_v59 = vunpack.c.h.b16 %v2325_v2  ;;  %v1992_v8 = vadd.f32 %v1991_v4, %v5319_v1  ;;  %v2010_v9 = vpop.f32.mrf.mxu3  ;;  %2950 = vmatpush.bf16.msrb.mxu1 %v4447_v38 }
 0x1b7   : > { %v1955_v42 = vpop.f32.mrf.mxu0 }
 0x1b8   : > { %v1974_v11 = vpop.f32.mrf.mxu1  ;;  %v5322_v12 = vpack.c.b16 %v2380_v7, %v2378_v3  ;;  %v5324_v13 = vpack.c.b16 %v2381_v59, %v2379_v6  ;;  %v2011_v5 = vadd.f32 %v2010_v9, %v1992_v8  ;;  %v1956_v15 = vadd.f32 %v1955_v42, %v1780_v0  ;;  %v4439_v3 = vld [vmem:[#allocation13 + $0x10] sm:$0xff]  ;;  %v4438_v59 = vld [vmem:[#allocation13 + $0x8] sm:$0xff] }
 0x1b9   : > { %2931 = vmatpush.bf16.msrb.mxu0 %v4439_v3  ;;  %v4446_v8 = vld [vmem:[#allocation13 + $0x48] sm:$0xff] }
 0x1ba   : > { %v2021_v19 = vmax.f32 %v2011_v5, 0.0  ;;  %v1975_v21 = vadd.f32 %v1974_v11, %v1956_v15  ;;  %2951 = vmatpush.bf16.msrb.mxu1 %v4446_v8  ;;  %v4437_v15 = vld [vmem:[#allocation13] sm:$0xff] }
 0x1bc   : > { %v2326_v28 = vpack.c.bf16 %v2021_v19, %v2020_v18  ;;  %v2022_v29 = vmax.f32 %v1975_v21, 0.0  ;;  %v4484_v18 = vld [vmem:[#allocation13 + $0x178] sm:$0xff]  ;;  %v4483_v21 = vld [vmem:[#allocation13 + $0x170] sm:$0xff] }
 0x1bd   : > { %v1993_v20 = vpop.f32.mrf.mxu2  ;;  %2932 = vmatpush.bf16.msrb.mxu0 %v4438_v59 }
 0x1be   : > { %v1994_v22 = vadd.f32 %v1993_v20, %v5319_v1  ;;  %v2012_v44 = vpop.f32.mrf.mxu3  ;;  %v2394_v10 = vunpack.c.l.b16 %v2326_v28  ;;  %v2395_v33 = vunpack.c.h.b16 %v2326_v28  ;;  %2952 = vmatpush.bf16.msrb.mxu1 %v4445_v16  ;;  %v4475_v20 = vld [vmem:[#allocation13 + $0x130] sm:$0xff] }
 0x1bf   : > { %v1958_v26 = vpop.f32.mrf.mxu0 }
 0x1c0   : > { %v2013_v27 = vadd.f32 %v2012_v44, %v1994_v22  ;;  %v1977_v39 = vpop.f32.mrf.mxu1  ;;  %v1959_v36 = vadd.f32 %v1958_v26, %v1780_v0  ;;  %v2064_v26 = vld [vmem:[%s5424_s12] sm:$0x3] }
 0x1c1   : > { %2933 = vmatpush.bf16.msrb.mxu0 %v4437_v15 }
 0x1c2   : > { %v2023_v25 = vmax.f32 %v2013_v27, 0.0  ;;  %v1978_v51 = vadd.f32 %v1977_v39, %v1959_v36  ;;  %3021 = vmatpush.bf16.msra.mxu1 %v4484_v18  ;;  %v5332_v27 = vperm.slane %v2064_v26, 1  ;;  %v2066_v39 = vperm.slane %v2064_v26, 0 }
 0x1c4   : > { %v2327_v30 = vpack.c.bf16 %v2023_v25, %v2022_v29  ;;  %v2024_v60 = vmax.f32 %v1978_v51, 0.0  ;;  %v4473_v29 = vld [vmem:[#allocation13 + $0x120] sm:$0xff] }
 0x1c5   : > { %v1996_v41 = vpop.f32.mrf.mxu2  ;;  %3002 = vmatpush.bf16.msra.mxu0 %v4476_v17  ;;  %v4481_v25 = vld [vmem:[#allocation13 + $0x160] sm:$0xff] }
 0x1c6   : > { %v2396_v34 = vunpack.c.l.b16 %v2327_v30  ;;  %v2397_v35 = vunpack.c.h.b16 %v2327_v30  ;;  %v1997_v58 = vadd.f32 %v1996_v41, %v5319_v1  ;;  %v2015_v40 = vpop.f32.mrf.mxu3  ;;  %3022 = vmatpush.bf16.msra.mxu1 %v4483_v21 }
 0x1c7   : > { %v1960_v63 = vpop.f32.mrf.mxu0 }
 0x1c8   : > { %v2402_v48 = vpack.c.b16 %v2396_v34, %v2394_v10  ;;  %v2403_v49 = vpack.c.b16 %v2397_v35, %v2395_v33  ;;  %v2016_v52 = vadd.f32 %v2015_v40, %v1997_v58  ;;  %v1961_v53 = vadd.f32 %v1960_v63, %v1780_v0  ;;  %v1979_v54 = vpop.f32.mrf.mxu1  ;;  %v4472_v34 = vld [vmem:[#allocation13 + $0x118] sm:$0xff]  ;;  %v4471_v40 = vld [vmem:[#allocation13 + $0x110] sm:$0xff] }
 0x1c9   : > { %3003 = vmatpush.bf16.msra.mxu0 %v4475_v20  ;;  %v4480_v35 = vld [vmem:[#allocation13 + $0x158] sm:$0xff]  ;;  %v4479_v63 = vld [vmem:[#allocation13 + $0x150] sm:$0xff] }
 0x1ca   : > { %3048 = vmatmul.bf16.vlgmr.msra.gmra.mxu2 %v2402_v48  ;;  %3067 = vmatmul.bf16.vlgmr.msra.gmra.mxu3 %v2403_v49  ;;  %v2025_v43 = vmax.f32 %v2016_v52, 0.0  ;;  %v1980_v61 = vadd.f32 %v1979_v54, %v1961_v53  ;;  %v4470_v54 = vld [vmem:[#allocation13 + $0x108] sm:$0xff] }
 0x1cb   : > { %3023 = vmatpush.bf16.msra.mxu1 %v4482_v24 }
 0x1cc   : > { %v2328_v0 = vpack.c.bf16 %v2025_v43, %v2024_v60  ;;  %v2026_v4 = vmax.f32 %v1980_v61, 0.0  ;;  %v4478_v61 = vld [vmem:[#allocation13 + $0x148] sm:$0xff] }
 0x1cd   : > { %v1998_v57 = vpop.f32.mrf.mxu2  ;;  %3004 = vmatpush.bf16.msra.mxu0 %v4474_v23 }
 0x1ce   : > { %v1999_v62 = vadd.f32 %v1998_v57, %v5319_v1  ;;  %v2017_v37 = vpop.f32.mrf.mxu3  ;;  %v2398_v9 = vunpack.c.l.b16 %v2328_v0  ;;  %v2399_v42 = vunpack.c.h.b16 %v2328_v0 }
 0x1cf   : > { %3024 = vmatpush.bf16.msra.mxu1 %v4481_v25 }
 0x1d0   : > { %v2018_v2 = vadd.f32 %v2017_v37, %v1999_v62  ;;  %v4469_v37 = vld [vmem:[#allocation13 + $0x100] sm:$0xff] }
 0x1d1   : > { %3005 = vmatpush.bf16.msra.mxu0 %v4473_v29 }
 0x1d2   : > { %v2027_v6 = vmax.f32 %v2018_v2, 0.0  ;;  %v4477_v2 = vld [vmem:[#allocation13 + $0x140] sm:$0xff] }
 0x1d3   : > { %3025 = vmatpush.bf16.msra.mxu1 %v4480_v35 }
 0x1d4   : > { %v2329_v7 = vpack.c.bf16 %v2027_v6, %v2026_v4 }
 0x1d5   : > { %3006 = vmatpush.bf16.msra.mxu0 %v4472_v34 }
 0x1d6   : > { %v2400_v11 = vunpack.c.l.b16 %v2329_v7  ;;  %v2401_v14 = vunpack.c.h.b16 %v2329_v7 }
 0x1d7   : > { %3026 = vmatpush.bf16.msra.mxu1 %v4479_v63 }
 0x1d8   : > { %v2404_v1 = vpack.c.b16 %v2400_v11, %v2398_v9  ;;  %v2405_v5 = vpack.c.b16 %v2401_v14, %v2399_v42 }
 0x1d9   : > { %3007 = vmatpush.bf16.msra.mxu0 %v4471_v40 }
 0x1da   : > { %3053 = vmatmul.bf16.gmra.mxu2 %v2404_v1  ;;  %3072 = vmatmul.bf16.gmra.mxu3 %v2405_v5 }
 0x1db   : > { %3027 = vmatpush.bf16.msra.mxu1 %v4478_v61 }
 0x1dd   : > { %v2239_v19 = vpop.f32.mrf.mxu0  ;;  %3008 = vmatpush.bf16.msra.mxu0 %v4470_v54 }
 0x1de   : > { %v2240_v33 = vadd.f32 %v2239_v19, %v2066_v39 }
 0x1df   : > { %3028 = vmatpush.bf16.msra.mxu1 %v4477_v2 }
 0x1e1   : > { %3009 = vmatpush.bf16.msra.mxu0 %v4469_v37 }
 0x1e3   : > { %v2258_v22 = vpop.f32.mrf.mxu1  ;;  %v2277_v44 = vpop.f32.mrf.mxu2 }
 0x1e4   : > { %v2278_v31 = vadd.f32 %v2277_v44, %v5332_v27  ;;  %v2259_v36 = vadd.f32 %v2258_v22, %v2240_v33 }
 0x1e5   : > { %v2241_v28 = vpop.f32.mrf.mxu0 }
 0x1e6   : > { %v2242_v58 = vadd.f32 %v2241_v28, %v2066_v39  ;;  %v2306_v52 = vmax.f32 %v2259_v36, 0.0 }
 0x1e9   : > { %v2296_v30 = vpop.f32.mrf.mxu3 }
 0x1ea   : > { %v2297_v41 = vadd.f32 %v2296_v30, %v2278_v31 }
 0x1eb   : > { %v2260_v32 = vpop.f32.mrf.mxu1  ;;  %v2279_v10 = vpop.f32.mrf.mxu2 }
 0x1ec   : > { %v2307_v45 = vmax.f32 %v2297_v41, 0.0  ;;  %v2261_v48 = vadd.f32 %v2260_v32, %v2242_v58  ;;  %v2280_v49 = vadd.f32 %v2279_v10, %v5332_v27 }
 0x1ed   : > { %v2244_v50 = vpop.f32.mrf.mxu0 }
 0x1ee   : > { %v2314_v57 = vpack.c.bf16 %v2307_v45, %v2306_v52  ;;  %v2308_v60 = vmax.f32 %v2261_v48, 0.0  ;;  %v2245_v42 = vadd.f32 %v2244_v50, %v2066_v39 }
 0x1f0   : > { %v2334_v3 = vunpack.c.l.b16 %v2314_v57  ;;  %v2335_v38 = vunpack.c.h.b16 %v2314_v57 }
 0x1f1   : > { %v2298_v51 = vpop.f32.mrf.mxu3 }
 0x1f2   : > { %v2299_v53 = vadd.f32 %v2298_v51, %v2280_v49 }
 0x1f3   : > { %v2263_v55 = vpop.f32.mrf.mxu1  ;;  %v2282_v56 = vpop.f32.mrf.mxu2 }
 0x1f4   : > { %v2309_v43 = vmax.f32 %v2299_v53, 0.0  ;;  %v2283_v8 = vadd.f32 %v2282_v56, %v5332_v27  ;;  %v2264_v5 = vadd.f32 %v2263_v55, %v2245_v42  ;;  %v3078_v53 = vlaneseq }
 0x1f5   : > { %v2246_v9 = vpop.f32.mrf.mxu0 }
 0x1f6   : > { %v2315_v62 = vpack.c.bf16 %v2309_v43, %v2308_v60  ;;  %v2247_v15 = vadd.f32 %v2246_v9, %v2066_v39  ;;  %v2310_v20 = vmax.f32 %v2264_v5, 0.0  ;;  %v5345_v61 = vand.u32 127, %v3078_v53 }
 0x1f8   : > { %v2336_v0 = vunpack.c.l.b16 %v2315_v62  ;;  %v2337_v4 = vunpack.c.h.b16 %v2315_v62  ;;  %vm3080_vm1 = vcmp.lt.s32.totalorder %v5345_v61, 5  ;;  %vm3081_vm2 = vcmp.ge.s32.totalorder %v5345_v61, 20 }
 0x1f9   : > { %v2301_v6 = vpop.f32.mrf.mxu3 }
 0x1fa   : > { %v2342_v7 = vpack.c.b16 %v2336_v0, %v2334_v3  ;;  %v2343_v59 = vpack.c.b16 %v2337_v4, %v2335_v38  ;;  %v2302_v11 = vadd.f32 %v2301_v6, %v2283_v8 }
 0x1fb   : > { %v2265_v14 = vpop.f32.mrf.mxu1  ;;  %v2284_v1 = vpop.f32.mrf.mxu2 }
 0x1fc   : > { %2934 = vmatmul.bf16.vlgmr.msrb.gmra.mxu0 %v2342_v7  ;;  %2953 = vmatmul.bf16.vlgmr.msrb.gmra.mxu1 %v2343_v59  ;;  %v2311_v16 = vmax.f32 %v2302_v11, 0.0  ;;  %v2266_v17 = vadd.f32 %v2265_v14, %v2247_v15  ;;  %v2285_v18 = vadd.f32 %v2284_v1, %v5332_v27 }
 0x1fe   : > { %v2316_v22 = vpack.c.bf16 %v2311_v16, %v2310_v20  ;;  %v2312_v44 = vmax.f32 %v2266_v17, 0.0 }
 0x200   : > { %v2338_v26 = vunpack.c.l.b16 %v2316_v22  ;;  %v2339_v28 = vunpack.c.h.b16 %v2316_v22 }
 0x201   : > { %v2303_v19 = vpop.f32.mrf.mxu3 }
 0x202   : > { %v2304_v21 = vadd.f32 %v2303_v19, %v2285_v18 }
 0x204   : > { %v2313_v23 = vmax.f32 %v2304_v21, 0.0 }
 0x206   : > { %v2317_v24 = vpack.c.bf16 %v2313_v23, %v2312_v44 }
 0x208   : > { %v2340_v29 = vunpack.c.l.b16 %v2317_v24  ;;  %v2341_v25 = vunpack.c.h.b16 %v2317_v24 }
 0x20a   : > { %v2344_v30 = vpack.c.b16 %v2340_v29, %v2338_v26  ;;  %v2345_v31 = vpack.c.b16 %v2341_v25, %v2339_v28 }
 0x20c   : > { %2939 = vmatmul.bf16.gmra.mxu0 %v2344_v30  ;;  %2958 = vmatmul.bf16.gmra.mxu1 %v2345_v31 }
 0x20d   : > { %v2973_v27 = vpop.f32.mrf.mxu2  ;;  %v2992_v39 = vpop.f32.mrf.mxu3 }
 0x215   : > { %v2975_v33 = vpop.f32.mrf.mxu2  ;;  %v2994_v41 = vpop.f32.mrf.mxu3 }
 0x21c   : > { %3010 = vmatmul.bf16.vlgmr.msra.gmra.mxu0 %v5310_v46  ;;  %3029 = vmatmul.bf16.vlgmr.msra.gmra.mxu1 %v5312_v47  ;;  %v4620_v46 = vld [vmem:[%s5426_s14] ss:$0 sm:$0xff] }
 0x21d   : > { %v2978_v36 = vpop.f32.mrf.mxu2  ;;  %v2997_v58 = vpop.f32.mrf.mxu3 }
 0x225   : > { %v2999_v45 = vpop.f32.mrf.mxu3 }
 0x22c   : > { %3015 = vmatmul.bf16.gmra.mxu0 %v5322_v12  ;;  %3034 = vmatmul.bf16.gmra.mxu1 %v5324_v13  ;;  %v2980_v12 = vpop.f32.mrf.mxu2 }
 0x24d   : > { %v3049_v52 = vpop.f32.mrf.mxu2  ;;  %v3068_v54 = vpop.f32.mrf.mxu3 }
 0x255   : > { %v3051_v38 = vpop.f32.mrf.mxu2  ;;  %v3070_v11 = vpop.f32.mrf.mxu3 }
 0x25d   : > { %v3054_v24 = vpop.f32.mrf.mxu2  ;;  %v3073_v25 = vpop.f32.mrf.mxu3 }
 0x279   : > { %v2935_v32 = vpop.f32.mrf.mxu0  ;;  %v2954_v10 = vpop.f32.mrf.mxu1 }
 0x27a   : > { %v2936_v63 = vadd.f32 %v4620_v46, %v2935_v32 }
 0x27c   : > { %v2955_v13 = vadd.f32 %v2954_v10, %v2936_v63 }
 0x27e   : > { %v2974_v50 = vadd.f32 %v2973_v27, %v2955_v13 }
 0x280   : > { %v2993_v56 = vadd.f32 %v2992_v39, %v2974_v50 }
 0x281   : > { %v2937_v34 = vpop.f32.mrf.mxu0  ;;  %v2956_v35 = vpop.f32.mrf.mxu1 }
 0x282   : > { %v2938_v51 = vadd.f32 %v4620_v46, %v2937_v34 }
 0x284   : > { %v2957_v55 = vadd.f32 %v2956_v35, %v2938_v51 }
 0x286   : > { %v2976_v62 = vadd.f32 %v2975_v33, %v2957_v55 }
 0x288   : > { %v2995_v6 = vadd.f32 %v2994_v41, %v2976_v62 }
 0x289   : > { %v2940_v40 = vpop.f32.mrf.mxu0  ;;  %v2959_v47 = vpop.f32.mrf.mxu1 }
 0x28a   : > { %v2941_v37 = vadd.f32 %v4620_v46, %v2940_v40  ;;  %v3075_v40 = vpop.f32.mrf.mxu3 }
 0x28c   : > { %v2960_v0 = vadd.f32 %v2959_v47, %v2941_v37 }
 0x28e   : > { %v2979_v14 = vadd.f32 %v2978_v36, %v2960_v0 }
 0x290   : > { %v2998_v18 = vadd.f32 %v2997_v58, %v2979_v14  ;;  %v3056_v58 = vpop.f32.mrf.mxu2 }
 0x291   : > { %v2942_v48 = vpop.f32.mrf.mxu0  ;;  %v2961_v49 = vpop.f32.mrf.mxu1 }
 0x292   : > { %v2943_v1 = vadd.f32 %v4620_v46, %v2942_v48 }
 0x294   : > { %v2962_v16 = vadd.f32 %v2961_v49, %v2943_v1 }
 0x296   : > { %v2981_v28 = vadd.f32 %v2980_v12, %v2962_v16 }
 0x298   : > { %v3000_v27 = vadd.f32 %v2999_v45, %v2981_v28 }
 0x299   : > { %v3011_v57 = vpop.f32.mrf.mxu0  ;;  %v3030_v60 = vpop.f32.mrf.mxu1 }
 0x29a   : > { %v3012_v43 = vadd.f32 %v3011_v57, %v2993_v56 }
 0x29c   : > { %v3031_v2 = vadd.f32 %v3030_v60, %v3012_v43 }
 0x29e   : > { %v3050_v3 = vadd.f32 %v3049_v52, %v3031_v2 }
 0x2a0   : > { %v3069_v4 = vadd.f32 %v3068_v54, %v3050_v3 }
 0x2a1   : > { %v3013_v7 = vpop.f32.mrf.mxu0  ;;  %v3032_v59 = vpop.f32.mrf.mxu1 }
 0x2a2   : > { %v3122_v8 = vmul.f32 1.442695, %v3069_v4  ;;  %v3014_v9 = vadd.f32 %v3013_v7, %v2995_v6  ;;  %v3082_v42 = vsel %vm3080_vm1, %v3069_v4, -1e+30 }
 0x2a3   : > { %3086 = vmax.xlane.f32.xlu0 %v3082_v42 }
 0x2a4   : > { %4621 = vpow2.f32 %v3122_v8  ;;  %v3033_v5 = vadd.f32 %v3032_v59, %v3014_v9 }
 0x2a6   : > { %v3052_v15 = vadd.f32 %v3051_v38, %v3033_v5 }
 0x2a8   : > { %v3071_v17 = vadd.f32 %v3070_v11, %v3052_v15 }
 0x2a9   : > { %v3016_v19 = vpop.f32.mrf.mxu0  ;;  %v3035_v20 = vpop.f32.mrf.mxu1 }
 0x2aa   : > { %v4622_v21 = vpop.eup %4621  ;;  %v3124_v22 = vmul.f32 1.442695, %v3071_v17  ;;  %v3017_v44 = vadd.f32 %v3016_v19, %v2998_v18  ;;  %v3083_v23 = vsel %vm3080_vm1, %v3071_v17, -1e+30 }
 0x2ab   : > { %v5355_v26 = vsel %vm3081_vm2, %v4622_v21, %v3069_v4  ;;  %3088 = vmax.xlane.f32.xlu0 %v3083_v23 }
 0x2ac   : > { %4623 = vpow2.f32 %v3124_v22  ;;  %v3036_v29 = vadd.f32 %v3035_v20, %v3017_v44 }
 0x2ae   : > { %v3055_v30 = vadd.f32 %v3054_v24, %v3036_v29 }
 0x2b0   : > { %v3074_v31 = vadd.f32 %v3073_v25, %v3055_v30 }
 0x2b1   : > { %v3018_v39 = vpop.f32.mrf.mxu0  ;;  %v3037_v35 = vpop.f32.mrf.mxu1 }
 0x2b2   : > { %v4624_v32 = vpop.eup %4623  ;;  %v3126_v10 = vmul.f32 1.442695, %v3074_v31  ;;  %v3019_v33 = vadd.f32 %v3018_v39, %v3000_v27  ;;  %v3084_v41 = vsel %vm3080_vm1, %v3074_v31, -1e+30 }
 0x2b3   : > { %v3131_v34 = vsel %vm3081_vm2, %v4624_v32, %v3071_v17  ;;  %3090 = vmax.xlane.f32.xlu1 %v3084_v41 }
 0x2b4   : > { %4625 = vpow2.f32 %v3126_v10  ;;  %v3038_v36 = vadd.f32 %v3037_v35, %v3019_v33 }
 0x2b6   : > { %v3057_v46 = vadd.f32 %v3056_v58, %v3038_v36 }
 0x2b8   : > { %v3076_v47 = vadd.f32 %v3075_v40, %v3057_v46 }
 0x2ba   : > { %v4626_v63 = vpop.eup %4625  ;;  %v3128_v12 = vmul.f32 1.442695, %v3076_v47  ;;  %v3085_v45 = vsel %vm3080_vm1, %v3076_v47, -1e+30 }
 0x2bb   : > { %v3132_v13 = vsel %vm3081_vm2, %v4626_v63, %v3074_v31  ;;  %3092 = vmax.xlane.f32.xlu1 %v3085_v45 }
 0x2bc   : > { %4627 = vpow2.f32 %v3128_v12 }
 0x2c2   : > { %v4628_v48 = vpop.eup %4627 }
 0x2c3   : > { %v3133_v49 = vsel %vm3081_vm2, %v4628_v48, %v3076_v47 }
 0x316   : > { %v3087_v50 = vpop.xlane.xlu0 %3086 }
 0x317   : > { %v3094_v51 = vsub.f32 %v3082_v42, %v3087_v50 }
 0x319   : > { %v3098_v52 = vmul.f32 1.442695, %v3094_v51 }
 0x31b   : > { %4629 = vpow2.f32 %v3098_v52 }
 0x31e   : > { %v3089_v53 = vpop.xlane.xlu0 %3088 }
 0x31f   : > { %v3095_v54 = vsub.f32 %v3083_v23, %v3089_v53 }
 0x321   : > { %v4630_v55 = vpop.eup %4629  ;;  %v3100_v56 = vmul.f32 1.442695, %v3095_v54 }
 0x322   : > { %3106 = vadd.xlane.f32.xlu2 %v4630_v55 }
 0x323   : > { %4631 = vpow2.f32 %v3100_v56 }
 0x326   : > { %v3091_v57 = vpop.xlane.xlu1 %3090 }
 0x327   : > { %v3096_v60 = vsub.f32 %v3084_v41, %v3091_v57 }
 0x329   : > { %v4632_v43 = vpop.eup %4631  ;;  %v3102_v62 = vmul.f32 1.442695, %v3096_v60 }
 0x32a   : > { %3108 = vadd.xlane.f32.xlu2 %v4632_v43 }
 0x32b   : > { %4633 = vpow2.f32 %v3102_v62 }
 0x32e   : > { %v3093_v37 = vpop.xlane.xlu1 %3092 }
 0x32f   : > { %v3097_v2 = vsub.f32 %v3085_v45, %v3093_v37 }
 0x331   : > { %v4634_v3 = vpop.eup %4633  ;;  %v3104_v38 = vmul.f32 1.442695, %v3097_v2 }
 0x332   : > { %3110 = vadd.xlane.f32.xlu0 %v4634_v3 }
 0x333   : > { %4635 = vpow2.f32 %v3104_v38 }
 0x339   : > { %v4636_v0 = vpop.eup %4635 }
 0x33a   : > { %3112 = vadd.xlane.f32.xlu1 %v4636_v0 }
 0x395   : > { %v3107_v4 = vpop.xlane.xlu2 %3106 }
 0x396   : > { %4637 = vrcp.f32 %v3107_v4 }
 0x39c   : > { %v4638_v6 = vpop.eup %4637 }
 0x39d   : > { %v3118_v7 = vmul.f32 %v4638_v6, %v4630_v55  ;;  %v3109_v59 = vpop.xlane.xlu2 %3108 }
 0x39e   : > { %4639 = vrcp.f32 %v3109_v59 }
 0x39f   : > { %v3134_v8 = vsel %vm3080_vm1, %v3118_v7, %v5355_v26 }
 0x3a0   : > { %3138 = vst [vmem:[%s604_s17] sm:$0xff] %v3134_v8 }
 0x3a4   : > { %v4640_v9 = vpop.eup %4639 }
 0x3a5   : > { %v3119_v42 = vmul.f32 %v4640_v9, %v4632_v43  ;;  %v3111_v11 = vpop.xlane.xlu0 %3110 }
 0x3a6   : > { %4641 = vrcp.f32 %v3111_v11 }
 0x3a7   : > { %v3135_v14 = vsel %vm3080_vm1, %v3119_v42, %v3131_v34 }
 0x3a8   : > { %3139 = vst [vmem:[%s604_s17 + $0x8] sm:$0xff] %v3135_v14 }
 0x3ac   : > { %v4642_v1 = vpop.eup %4641 }
 0x3ad   : > { %v3120_v5 = vmul.f32 %v4642_v1, %v4634_v3  ;;  %v3113_v15 = vpop.xlane.xlu1 %3112 }
 0x3ae   : > { %4643 = vrcp.f32 %v3113_v15 }
 0x3af   : > { %v3136_v16 = vsel %vm3080_vm1, %v3120_v5, %v3132_v13 }
 0x3b0   : > { %3140 = vst [vmem:[%s604_s17 + $0x10] sm:$0xff] %v3136_v16 }
 0x3b4   : > { %v4644_v17 = vpop.eup %4643 }
 0x3b5   : > { %v3121_v18 = vmul.f32 %v4644_v17, %v4636_v0 }
 0x3b7   : > { %v3137_v19 = vsel %vm3080_vm1, %v3121_v18, %v3133_v49 }
 0x3b8   : > { %3141 = vst [vmem:[%s604_s17 + $0x18] sm:$0xff] %v3137_v19 }
 0x3b9   : > { %4882 = shalt.err (!%p4879_p8)
}
 0x3ba   : > { %s4948_s30 = smov 128   ;;  %s4949_s16 = smov 8  }
 0x3bb   : > { %4530 = dma.vmem_to_hbm [thread:$0]  (%p5068_p5), %s3156_s23, 512, %s3158_s18, %s3143_s22, %s4948_s30, %s4948_s30, %s4949_s16  }
 0x3bc PF: > { %s5459_s17 = sld [smem:[#allocation22_spill]] }
 0x3bd   : > { %s5460_s25 = sld [smem:[#allocation20_spill]] }
 0x3c2   : > { %p4572_p9 = scmp.ge.s32.totalorder %s5459_s17, 2 }
 0x3c3   : > { %s3172_s20 = sand.u32 1, %s5460_s25  }
 0x3c4   : > { %p4555_p10 = pnand %p4572_p9, %p5072_p6  ;;  %s3173_s7 = scalar_lea.sflag [#allocation4], %s3172_s20 }
 0x3c6   : > { %p4556_p11 = pneg %p4555_p10 }
 0x3c8   : > { %4916 = dma.done.wait (%p4556_p11), %s3173_s7, 512  }
 0x3c9   : > { %4918 = vsyncadd (%p4556_p11), %s3173_s7, 4294966784  ;;  %s5462_s21 = sld [smem:[#allocation23_spill]]  ;;  %s5465_s18 = smov %s4925_s19 }
 0x3ca   : > { %s5463_s26 = sld [smem:[#allocation21_spill]] }
 0x3cb   : > { %s5464_s20 = sld [smem:[#allocation24_spill]] }
 0x3cf   : > { %p29_p12 = scmp.ge.s32.totalorder %s5462_s21, 4  }
 0x3d0   : > { %s5466_s19 = smov %s5463_s26 }
 0x3d1   :  { %31 = sbr.rel (!%p29_p12) target bundleno = 13 (0xd), region = 144 }
 0x3d6   :  { %3179 = vsyncpa [#allocation3], 1 }
 0x3d7   :  { %3181 = vsyncpa [#allocation3 + $0x1], 1 }
 0x3d8   :  { %3182 = vsyncpa [#allocation6], 1 }
 0x3d9   :  { %3183 = vsyncpa [#allocation9], 1 }
 0x3da   :  { %3184 = vsyncpa [#allocation12], 1 }
 0x3db   :  { %3185 = vsyncpa [#allocation4], 1 }
 0x3dc   :  { %3187 = vsyncpa [#allocation4 + $0x1], 1 }

</bundles_post_ra>
